<compile_context>
chip_gen: v6e
topology: v6e:2x2x1
jax: 0.10.0
libtpu: 0.0.40
codegen_flags: <defaults>
</compile_context>

<pallas_src>
import functools

import jax
import jax.numpy as jnp
from jax.experimental import pallas as pl
from jax.experimental.pallas import tpu as pltpu

# ---- model dimensions (consistent with the module's dim_r / dim_a / dim_v) --
DIM_R = 16                 # latent dim (prior)
DIM_G = 6                  # geometry conditional dim
HID   = 64                 # decoder hidden width
DIM_V = 128                # output voxel dim (lane aligned)
EPS   = 1e-6


def _round_up(x, m):
    return ((x + m - 1) // m) * m


# ----------------------------------------------------------------------------
# kernel bodies
# ----------------------------------------------------------------------------
def _decoder_body(z, e, ang, geo, w1z_ref, w1g_ref, w1e_ref, w1a_ref, b1_ref,
                  w2_ref, b2_ref, out_ref, *, ep_dtype, approx_recip):
    """Fused decoder + gamma head for one (TB, .) batch tile."""
    # layer 1: fused [z, e, angle, geo] @ W1 -- the concat is never built.
    # MXU dots in bf16 with f32 accumulation; rank-1 e/angle terms on the VPU.
    h = jnp.dot(z.astype(jnp.bfloat16), w1z_ref[...],
                preferred_element_type=jnp.float32)
    h = h + jnp.dot(geo.astype(jnp.bfloat16), w1g_ref[...],
                    preferred_element_type=jnp.float32)
    h = h + (e * w1e_ref[...] + ang * w1a_ref[...] + b1_ref[...])
    h = jnp.maximum(h, 0.0)

    # layer 2: raw gamma parameters.
    p = jnp.dot(h.astype(jnp.bfloat16), w2_ref[...],
                preferred_element_type=jnp.float32)
    p = (p + b2_ref[...]).astype(ep_dtype)

    # gamma head: one lane-dense softplus over (TB, 2*DIM_V), sliced after
    # (the DIM_V=128 column boundary is vreg aligned so slices stay views).
    # ep_dtype is bf16 on v6e/v7x (bf16 EUP/VPU), f32 on v5e.
    sp = jax.nn.softplus(p) + EPS
    alpha = sp[:, :DIM_V].astype(jnp.float32)
    beta = sp[:, DIM_V:].astype(jnp.float32)
    if approx_recip:
        mean = alpha * pl.reciprocal(beta, approx=True)   # EUP vrcp (~1e-4 rel)
    else:
        mean = alpha / beta                               # exact, for validation
    out_ref[...] = mean.astype(out_ref.dtype)


def _mle_kernel_rng(seed_ref, e_ref, a_ref, g_ref, w1z_ref, w1g_ref, w1e_ref,
                    w1a_ref, b1_ref, w2_ref, b2_ref, out_ref, *,
                    ep_dtype, approx_recip):
    """z ~ N(0, I) drawn in-kernel from the hardware PRNG (per-tile seed)."""
    # NOTE: per-tile reseed (seed + program_id) is not statistically identical
    # to a single jax.random.normal draw; use the z path for bit-stable runs.
    pltpu.prng_seed(seed_ref[0] + pl.program_id(0))
    z = pltpu.stateful_normal((out_ref.shape[0], DIM_R), jnp.float32)
    _decoder_body(z, e_ref[...], a_ref[...], g_ref[...], w1z_ref, w1g_ref,
                  w1e_ref, w1a_ref, b1_ref, w2_ref, b2_ref, out_ref,
                  ep_dtype=ep_dtype, approx_recip=approx_recip)


def _mle_kernel_z(z_ref, e_ref, a_ref, g_ref, w1z_ref, w1g_ref, w1e_ref,
                  w1a_ref, b1_ref, w2_ref, b2_ref, out_ref, *,
                  ep_dtype, approx_recip):
    """z supplied from the wrapper (exact jax.random.normal semantics)."""
    _decoder_body(z_ref[...], e_ref[...], a_ref[...], g_ref[...], w1z_ref,
                  w1g_ref, w1e_ref, w1a_ref, b1_ref, w2_ref, b2_ref, out_ref,
                  ep_dtype=ep_dtype, approx_recip=approx_recip)


# ----------------------------------------------------------------------------
# pallas_call plumbing
# ----------------------------------------------------------------------------
def _batch_map(i, *_):          # batch-tiled arrays
    return (i, 0)


def _const_map(i, *_):          # weights / biases: DMA'd once, VMEM resident
    return (0, 0)


def _specs(tb, with_z):
    in_specs = []
    if with_z:
        in_specs.append(pl.BlockSpec((tb, DIM_R), _batch_map))
    in_specs += [
        pl.BlockSpec((tb, 1), _batch_map),            # e
        pl.BlockSpec((tb, 1), _batch_map),            # angle
        pl.BlockSpec((tb, DIM_G), _batch_map),        # geo
        pl.BlockSpec((DIM_R, HID), _const_map),       # w1z
        pl.BlockSpec((DIM_G, HID), _const_map),       # w1g
        pl.BlockSpec((1, HID), _const_map),           # w1e
        pl.BlockSpec((1, HID), _const_map),           # w1a
        pl.BlockSpec((1, HID), _const_map),           # b1
        pl.BlockSpec((HID, 2 * DIM_V), _const_map),   # w2
        pl.BlockSpec((1, 2 * DIM_V), _const_map),     # b2
    ]
    out_specs = pl.BlockSpec((tb, DIM_V), _batch_map)
    return in_specs, out_specs


def _tile_rows(batch, block_rows):
    """Largest tile <= block_rows (sublane-rounded), kept small enough that the
    grid has >= 2 steps whenever the batch allows it, so the 'parallel' grid
    axis actually feeds both TensorCores on v7x and the pipeline has work."""
    tb = min(batch, block_rows)
    if tb < batch:
        tb = _round_up(tb, 8)
    if batch > 16 and pl.cdiv(batch, tb) < 2:
        tb = _round_up(pl.cdiv(batch, 2), 8)
    return tb


def _compiler_params():
    # 32 MiB scoped VMEM is safe on every generation (v7x physical VMEM is
    # 64 MiB); double-buffered per-tile footprint at TB=4096 is only ~5 MB.
    return pltpu.CompilerParams(
        dimension_semantics=("parallel",),      # megacore split on v7x
        vmem_limit_bytes=32 * 1024 * 1024,
    )


def _cost_estimate(batch, out_dtype):
    flops = (2 * batch * (DIM_R * HID + DIM_G * HID + HID * 2 * DIM_V)
             + 4 * batch * HID)
    transcendentals = batch * (2 * 2 * DIM_V + DIM_V)   # softplus(exp+log)+recip
    weight_bytes = (2 * ((DIM_R + DIM_G) * HID + HID * 2 * DIM_V)
                    + 4 * (3 * HID + 2 * DIM_V))
    out_bytes = jnp.dtype(out_dtype).itemsize
    bytes_accessed = (batch * (4 * (2 + DIM_G + DIM_R) + out_bytes * DIM_V)
                      + weight_bytes)
    return pl.CostEstimate(flops=flops, transcendentals=transcendentals,
                           bytes_accessed=bytes_accessed)


@functools.lru_cache(maxsize=1)
def _epilogue_dtype():
    """bf16 epilogue on v6e/v7x (bf16-native VPU/EUP), f32 elsewhere (v5e)."""
    try:
        kind = jax.devices()[0].device_kind.lower()
    except Exception:
        kind = ""
    if ("v6" in kind) or ("v7" in kind):
        return jnp.bfloat16
    return jnp.float32


_KERNEL_RNG_OK = None


def _kernel_rng_supported():
    """One-time cached probe: can the stateful hardware PRNG be lowered/run?"""
    global _KERNEL_RNG_OK
    if _KERNEL_RNG_OK is not None:
        return _KERNEL_RNG_OK
    if not (hasattr(pltpu, "prng_seed") and hasattr(pltpu, "stateful_normal")):
        _KERNEL_RNG_OK = False
        return False

    def _probe(seed_ref, o_ref):
        pltpu.prng_seed(seed_ref[0])
        o_ref[...] = pltpu.stateful_normal((8, 128), jnp.float32)

    try:
        out = pl.pallas_call(
            _probe,
            out_shape=jax.ShapeDtypeStruct((8, 128), jnp.float32),
            grid_spec=pltpu.PrefetchScalarGridSpec(
                num_scalar_prefetch=1, grid=(1,), in_specs=[],
                out_specs=pl.BlockSpec((8, 128), lambda i, s: (0, 0))),
        )(jnp.zeros((1,), jnp.int32))
        jax.block_until_ready(out)
        _KERNEL_RNG_OK = True
    except Exception:   # capability probe only; runs once per process
        _KERNEL_RNG_OK = False
    return _KERNEL_RNG_OK


# ----------------------------------------------------------------------------
# public wrappers
# ----------------------------------------------------------------------------
def mle_decode_rng(seed, e, ang, geo, params, *, block_rows=2048,
                   out_dtype=jnp.bfloat16, approx_recip=True):
    w1z, w1g, w1e, w1a, b1, w2, b2 = params
    batch = e.shape[0]
    tb = _tile_rows(batch, block_rows)
    in_specs, out_specs = _specs(tb, with_z=False)
    kernel = functools.partial(_mle_kernel_rng, ep_dtype=_epilogue_dtype(),
                               approx_recip=approx_recip)
    return pl.pallas_call(
        kernel,
        out_shape=jax.ShapeDtypeStruct((batch, DIM_V), out_dtype),
        grid_spec=pltpu.PrefetchScalarGridSpec(
            num_scalar_prefetch=1,
            grid=(pl.cdiv(batch, tb),),
            in_specs=in_specs,
            out_specs=out_specs),
        compiler_params=_compiler_params(),
        cost_estimate=_cost_estimate(batch, out_dtype),
    )(seed, e, ang, geo, w1z, w1g, w1e, w1a, b1, w2, b2)


def mle_decode_z(z, e, ang, geo, params, *, block_rows=2048,
                 out_dtype=jnp.bfloat16, approx_recip=True):
    w1z, w1g, w1e, w1a, b1, w2, b2 = params
    batch = e.shape[0]
    tb = _tile_rows(batch, block_rows)
    in_specs, out_specs = _specs(tb, with_z=True)
    kernel = functools.partial(_mle_kernel_z, ep_dtype=_epilogue_dtype(),
                               approx_recip=approx_recip)
    return pl.pallas_call(
        kernel,
        out_shape=jax.ShapeDtypeStruct((batch, DIM_V), out_dtype),
        grid_spec=pltpu.PrefetchScalarGridSpec(
            num_scalar_prefetch=0,
            grid=(pl.cdiv(batch, tb),),
            in_specs=in_specs,
            out_specs=out_specs),
        compiler_params=_compiler_params(),
        cost_estimate=_cost_estimate(batch, out_dtype),
    )(z, e, ang, geo, w1z, w1g, w1e, w1a, b1, w2, b2)


def mle_forward(inputs, params, z_key, *, block_rows=2048,
                out_dtype=jnp.bfloat16, approx_recip=True,
                use_kernel_rng=None):
    """Mirror of MLE.forward / MLE.generate (sampling path). No device sync."""
    _x_input, e_input, angle_input, geo_input = inputs
    if e_input.ndim == 1:
        e_input = e_input[:, None]
        angle_input = angle_input[:, None]
    e = e_input.astype(jnp.float32)
    ang = angle_input.astype(jnp.float32)
    geo = geo_input.astype(jnp.float32)
    batch = e.shape[0]

    if use_kernel_rng is None:
        use_kernel_rng = _kernel_rng_supported()

    if use_kernel_rng:
        seed = jax.random.randint(z_key, (1,), 0, 2**31 - 1, dtype=jnp.int32)
        return mle_decode_rng(seed, e, ang, geo, params, block_rows=block_rows,
                              out_dtype=out_dtype, approx_recip=approx_recip)

    z = jax.random.normal(z_key, (batch, DIM_R), dtype=jnp.float32)
    return mle_decode_z(z, e, ang, geo, params, block_rows=block_rows,
                        out_dtype=out_dtype, approx_recip=approx_recip)


def init_params(key):
    k1, k2 = jax.random.split(key, 2)
    fan_in1 = DIM_R + 2 + DIM_G
    s1 = 1.0 / jnp.sqrt(jnp.float32(fan_in1))
    s2 = 1.0 / jnp.sqrt(jnp.float32(HID))
    # One monolithic W1, row-split along [z | e | angle | geo] so the concat is
    # fused in-kernel.  MXU halves stored bf16 (halves DMA bytes, bf16-native
    # MXU); the rank-1 e/angle rows and biases stay f32 (f32 accumulate path).
    w1 = jax.random.normal(k1, (fan_in1, HID), jnp.float32) * s1
    w1z = w1[:DIM_R].astype(jnp.bfloat16)
    w1e = w1[DIM_R:DIM_R + 1]
    w1a = w1[DIM_R + 1:DIM_R + 2]
    w1g = w1[DIM_R + 2:].astype(jnp.bfloat16)
    b1 = jnp.zeros((1, HID), jnp.float32)
    w2 = (jax.random.normal(k2, (HID, 2 * DIM_V), jnp.float32) * s2).astype(jnp.bfloat16)
    b2 = jnp.zeros((1, 2 * DIM_V), jnp.float32)
    return (w1z, w1g, w1e, w1a, b1, w2, b2)


if __name__ == "__main__":
    B = 256   # with the default tile logic this yields a 2-step parallel grid
    key = jax.random.PRNGKey(0)
    k_params, k_x, k_e, k_a, k_g, k_z = jax.random.split(key, 6)

    params = init_params(k_params)

    x_input = jax.random.uniform(k_x, (B, DIM_V), jnp.float32)     # unused in forward
    e_input = jax.random.uniform(k_e, (B,), jnp.float32)           # energies
    angle_input = jax.random.uniform(k_a, (B,), jnp.float32)       # angles
    geo_input = jax.random.uniform(k_g, (B, DIM_G), jnp.float32)   # geometry conds

    out = mle_forward((x_input, e_input, angle_input, geo_input), params, k_z)
    out = jax.block_until_ready(out)

    assert out.shape == (B, DIM_V)
    out_f32 = out.astype(jnp.float32)
    assert bool(jnp.all(jnp.isfinite(out_f32)))
    assert bool(jnp.all(out_f32 > 0.0))   # gamma mean must be positive
    print("KERNEL_OK")
</pallas_src>

<mosaic_0001>
module attributes {stable_mosaic.version = 11 : i64} {
  func.func @_probe(%arg0: i32, %arg1: memref<1xi32, #tpu.memory_space<smem>>, %arg2: memref<8x128xf32, #tpu.memory_space<vmem>>) attributes {dimension_semantics = [#tpu.dimension_semantics<arbitrary>], iteration_bounds = array<i64: 1>, scalar_prefetch = 1 : i64, scratch_operands = 0 : i64, tpu.core_type = #tpu.core_type<tc>, window_params = [{pipeline_mode = #tpu.pipeline_mode<synchronous>, transform_indices = @transform_0, window_bounds = array<i64: 8, 128>}]} {
    %c0 = arith.constant 0 : index
    %0 = memref.load %arg1[%c0] : memref<1xi32, #tpu.memory_space<smem>>
    "tpu.prng_set_seed_32"(%0) : (i32) -> ()
    %c0_i32 = arith.constant 0 : i32
    %c0_i32_0 = arith.constant 0 : i32
    %cst = arith.constant -0.99999994 : f32
    %cst_1 = arith.constant 1.000000e+00 : f32
    %1 = vector.broadcast %cst : f32 to vector<1x1xf32>
    %2 = vector.broadcast %cst_1 : f32 to vector<1x1xf32>
    %3 = "tpu.prng_random_bits"() : () -> vector<8x128xi32>
    %c9_i32 = arith.constant 9 : i32
    %4 = vector.broadcast %c9_i32 : i32 to vector<8x128xi32>
    %5 = arith.shrui %3, %4 : vector<8x128xi32>
    %c1065353216_i32 = arith.constant 1065353216 : i32
    %6 = vector.broadcast %c1065353216_i32 : i32 to vector<8x128xi32>
    %7 = arith.ori %5, %6 : vector<8x128xi32>
    %8 = tpu.bitcast %7 : vector<8x128xi32> -> vector<8x128xf32>
    %cst_2 = arith.constant 1.000000e+00 : f32
    %9 = vector.broadcast %cst_2 : f32 to vector<8x128xf32>
    %10 = arith.subf %8, %9 : vector<8x128xf32>
    %11 = arith.subf %2, %1 : vector<1x1xf32>
    %12 = vector.broadcast %11 : vector<1x1xf32> to vector<8x128xf32>
    %13 = arith.mulf %10, %12 : vector<8x128xf32>
    %14 = vector.broadcast %1 : vector<1x1xf32> to vector<8x128xf32>
    %15 = arith.addf %13, %14 : vector<8x128xf32>
    %16 = vector.broadcast %1 : vector<1x1xf32> to vector<8x128xf32>
    %17 = arith.maximumf %16, %15 : vector<8x128xf32>
    %cst_3 = arith.constant 0.000000e+00 : f32
    %18 = vector.broadcast %cst_3 : f32 to vector<8x128xf32>
    %19 = arith.subf %18, %17 : vector<8x128xf32>
    %20 = arith.mulf %17, %19 : vector<8x128xf32>
    %21 = math.log1p %20 : vector<8x128xf32>
    %cst_4 = arith.constant 0.000000e+00 : f32
    %22 = vector.broadcast %cst_4 : f32 to vector<8x128xf32>
    %23 = arith.subf %22, %21 : vector<8x128xf32>
    %cst_5 = arith.constant 5.000000e+00 : f32
    %24 = vector.broadcast %cst_5 : f32 to vector<8x128xf32>
    %25 = arith.cmpf olt, %23, %24 : vector<8x128xf32>
    %cst_6 = arith.constant 2.500000e+00 : f32
    %26 = vector.broadcast %cst_6 : f32 to vector<8x128xf32>
    %27 = arith.subf %23, %26 : vector<8x128xf32>
    %28 = math.sqrt %23 : vector<8x128xf32>
    %cst_7 = arith.constant 3.000000e+00 : f32
    %29 = vector.broadcast %cst_7 : f32 to vector<8x128xf32>
    %30 = arith.subf %28, %29 : vector<8x128xf32>
    %31 = arith.select %25, %27, %30 : vector<8x128xi1>, vector<8x128xf32>
    %cst_8 = arith.constant 2.81022636E-8 : f32
    %cst_9 = arith.constant -2.00214257E-4 : f32
    %32 = vector.broadcast %cst_8 : f32 to vector<8x128xf32>
    %33 = vector.broadcast %cst_9 : f32 to vector<8x128xf32>
    %34 = arith.select %25, %32, %33 : vector<8x128xi1>, vector<8x128xf32>
    %cst_10 = arith.constant 3.43273939E-7 : f32
    %cst_11 = arith.constant 1.00950558E-4 : f32
    %35 = vector.broadcast %cst_10 : f32 to vector<8x128xf32>
    %36 = vector.broadcast %cst_11 : f32 to vector<8x128xf32>
    %37 = arith.select %25, %35, %36 : vector<8x128xi1>, vector<8x128xf32>
    %38 = arith.mulf %34, %31 : vector<8x128xf32>
    %39 = arith.addf %37, %38 : vector<8x128xf32>
    %cst_12 = arith.constant -3.5233877E-6 : f32
    %cst_13 = arith.constant 0.00134934322 : f32
    %40 = vector.broadcast %cst_12 : f32 to vector<8x128xf32>
    %41 = vector.broadcast %cst_13 : f32 to vector<8x128xf32>
    %42 = arith.select %25, %40, %41 : vector<8x128xi1>, vector<8x128xf32>
    %43 = arith.mulf %39, %31 : vector<8x128xf32>
    %44 = arith.addf %42, %43 : vector<8x128xf32>
    %cst_14 = arith.constant -4.39150654E-6 : f32
    %cst_15 = arith.constant -0.00367342844 : f32
    %45 = vector.broadcast %cst_14 : f32 to vector<8x128xf32>
    %46 = vector.broadcast %cst_15 : f32 to vector<8x128xf32>
    %47 = arith.select %25, %45, %46 : vector<8x128xi1>, vector<8x128xf32>
    %48 = arith.mulf %44, %31 : vector<8x128xf32>
    %49 = arith.addf %47, %48 : vector<8x128xf32>
    %cst_16 = arith.constant 2.1858087E-4 : f32
    %cst_17 = arith.constant 0.00573950773 : f32
    %50 = vector.broadcast %cst_16 : f32 to vector<8x128xf32>
    %51 = vector.broadcast %cst_17 : f32 to vector<8x128xf32>
    %52 = arith.select %25, %50, %51 : vector<8x128xi1>, vector<8x128xf32>
    %53 = arith.mulf %49, %31 : vector<8x128xf32>
    %54 = arith.addf %52, %53 : vector<8x128xf32>
    %cst_18 = arith.constant -0.00125372503 : f32
    %cst_19 = arith.constant -0.0076224613 : f32
    %55 = vector.broadcast %cst_18 : f32 to vector<8x128xf32>
    %56 = vector.broadcast %cst_19 : f32 to vector<8x128xf32>
    %57 = arith.select %25, %55, %56 : vector<8x128xi1>, vector<8x128xf32>
    %58 = arith.mulf %54, %31 : vector<8x128xf32>
    %59 = arith.addf %57, %58 : vector<8x128xf32>
    %cst_20 = arith.constant -0.00417768164 : f32
    %cst_21 = arith.constant 0.00943887047 : f32
    %60 = vector.broadcast %cst_20 : f32 to vector<8x128xf32>
    %61 = vector.broadcast %cst_21 : f32 to vector<8x128xf32>
    %62 = arith.select %25, %60, %61 : vector<8x128xi1>, vector<8x128xf32>
    %63 = arith.mulf %59, %31 : vector<8x128xf32>
    %64 = arith.addf %62, %63 : vector<8x128xf32>
    %cst_22 = arith.constant 0.246640727 : f32
    %cst_23 = arith.constant 1.00167406 : f32
    %65 = vector.broadcast %cst_22 : f32 to vector<8x128xf32>
    %66 = vector.broadcast %cst_23 : f32 to vector<8x128xf32>
    %67 = arith.select %25, %65, %66 : vector<8x128xi1>, vector<8x128xf32>
    %68 = arith.mulf %64, %31 : vector<8x128xf32>
    %69 = arith.addf %67, %68 : vector<8x128xf32>
    %cst_24 = arith.constant 1.50140941 : f32
    %cst_25 = arith.constant 2.83297682 : f32
    %70 = vector.broadcast %cst_24 : f32 to vector<8x128xf32>
    %71 = vector.broadcast %cst_25 : f32 to vector<8x128xf32>
    %72 = arith.select %25, %70, %71 : vector<8x128xi1>, vector<8x128xf32>
    %73 = arith.mulf %69, %31 : vector<8x128xf32>
    %74 = arith.addf %72, %73 : vector<8x128xf32>
    %75 = math.absf %17 : vector<8x128xf32>
    %cst_26 = arith.constant 1.000000e+00 : f32
    %76 = vector.broadcast %cst_26 : f32 to vector<8x128xf32>
    %77 = arith.cmpf oeq, %75, %76 : vector<8x128xf32>
    %cst_27 = arith.constant 0x7F800000 : f32
    %78 = vector.broadcast %cst_27 : f32 to vector<8x128xf32>
    %79 = arith.mulf %78, %17 : vector<8x128xf32>
    %80 = arith.mulf %74, %17 : vector<8x128xf32>
    %81 = arith.select %77, %79, %80 : vector<8x128xi1>, vector<8x128xf32>
    %cst_28 = arith.constant 1.41421354 : f32
    %82 = vector.broadcast %cst_28 : f32 to vector<8x128xf32>
    %83 = arith.mulf %82, %81 : vector<8x128xf32>
    %c0_29 = arith.constant 0 : index
    %c0_30 = arith.constant 0 : index
    %84 = vector.load %arg2[%c0_29, %c0_30] : memref<8x128xf32, #tpu.memory_space<vmem>>, vector<8x128xf32>
    tpu.vector_store %arg2[%c0_29, %c0_30], %83 {strides = array<i32>} : memref<8x128xf32, #tpu.memory_space<vmem>>, vector<8x128xf32>,
    return
  }
  func.func @transform_0(%arg0: i32, %arg1: memref<1xi32, #tpu.memory_space<smem>>) -> (i32, i32) {
    %c0_i32 = arith.constant 0 : i32
    %c0_i32_0 = arith.constant 0 : i32
    %c0_i32_1 = arith.constant 0 : i32
    return %c0_i32, %c0_i32_0 : i32, i32
  }
}

module attributes {stable_mosaic.version = 11 : i64} {
  func.func @_mle_kernel_z(%arg0: i32, %arg1: memref<128x16xf32, #tpu.memory_space<vmem>>, %arg2: memref<128x1xf32, #tpu.memory_space<vmem>>, %arg3: memref<128x1xf32, #tpu.memory_space<vmem>>, %arg4: memref<128x6xf32, #tpu.memory_space<vmem>>, %arg5: memref<16x64xbf16, #tpu.memory_space<vmem>>, %arg6: memref<6x64xbf16, #tpu.memory_space<vmem>>, %arg7: memref<1x64xf32, #tpu.memory_space<vmem>>, %arg8: memref<1x64xf32, #tpu.memory_space<vmem>>, %arg9: memref<1x64xf32, #tpu.memory_space<vmem>>, %arg10: memref<64x256xbf16, #tpu.memory_space<vmem>>, %arg11: memref<1x256xf32, #tpu.memory_space<vmem>>, %arg12: memref<128x128xbf16, #tpu.memory_space<vmem>>) attributes {dimension_semantics = [#tpu.dimension_semantics<parallel>], iteration_bounds = array<i64: 2>, scalar_prefetch = 0 : i64, scratch_operands = 0 : i64, tpu.core_type = #tpu.core_type<tc>, window_params = [{transform_indices = @transform_0, window_bounds = array<i64: 128, 16>}, {transform_indices = @transform_1, window_bounds = array<i64: 128, 1>}, {transform_indices = @transform_2, window_bounds = array<i64: 128, 1>}, {transform_indices = @transform_3, window_bounds = array<i64: 128, 6>}, {pipeline_mode = #tpu.pipeline_mode<synchronous>, transform_indices = @transform_4, window_bounds = array<i64: 16, 64>}, {pipeline_mode = #tpu.pipeline_mode<synchronous>, transform_indices = @transform_5, window_bounds = array<i64: 6, 64>}, {pipeline_mode = #tpu.pipeline_mode<synchronous>, transform_indices = @transform_6, window_bounds = array<i64: 1, 64>}, {pipeline_mode = #tpu.pipeline_mode<synchronous>, transform_indices = @transform_7, window_bounds = array<i64: 1, 64>}, {pipeline_mode = #tpu.pipeline_mode<synchronous>, transform_indices = @transform_8, window_bounds = array<i64: 1, 64>}, {pipeline_mode = #tpu.pipeline_mode<synchronous>, transform_indices = @transform_9, window_bounds = array<i64: 64, 256>}, {pipeline_mode = #tpu.pipeline_mode<synchronous>, transform_indices = @transform_10, window_bounds = array<i64: 1, 256>}, {transform_indices = @transform_11, window_bounds = array<i64: 128, 128>}]} {
    %c0 = arith.constant 0 : index
    %c0_0 = arith.constant 0 : index
    %0 = vector.load %arg1[%c0, %c0_0] : memref<128x16xf32, #tpu.memory_space<vmem>>, vector<128x16xf32>
    %c0_1 = arith.constant 0 : index
    %c0_2 = arith.constant 0 : index
    %1 = vector.load %arg2[%c0_1, %c0_2] : memref<128x1xf32, #tpu.memory_space<vmem>>, vector<128x1xf32>
    %c0_3 = arith.constant 0 : index
    %c0_4 = arith.constant 0 : index
    %2 = vector.load %arg3[%c0_3, %c0_4] : memref<128x1xf32, #tpu.memory_space<vmem>>, vector<128x1xf32>
    %c0_5 = arith.constant 0 : index
    %c0_6 = arith.constant 0 : index
    %3 = vector.load %arg4[%c0_5, %c0_6] : memref<128x6xf32, #tpu.memory_space<vmem>>, vector<128x6xf32>
    %4 = arith.truncf %0 : vector<128x16xf32> to vector<128x16xbf16>
    %c0_7 = arith.constant 0 : index
    %c0_8 = arith.constant 0 : index
    %5 = vector.load %arg5[%c0_7, %c0_8] : memref<16x64xbf16, #tpu.memory_space<vmem>>, vector<16x64xbf16>
    %cst = arith.constant dense<0.000000e+00> : vector<128x64xf32>
    %6 = tpu.matmul %4, %5, %cst {dimension_numbers = #tpu.dot_dimension_numbers<[1], [0], [0], [1], [0, 0, 1, 1], [], []>} : vector<128x16xbf16>, vector<16x64xbf16>, vector<128x64xf32> -> vector<128x64xf32>
    %7 = arith.truncf %3 : vector<128x6xf32> to vector<128x6xbf16>
    %c0_9 = arith.constant 0 : index
    %c0_10 = arith.constant 0 : index
    %8 = vector.load %arg6[%c0_9, %c0_10] : memref<6x64xbf16, #tpu.memory_space<vmem>>, vector<6x64xbf16>
    %cst_11 = arith.constant dense<0.000000e+00> : vector<128x64xf32>
    %9 = tpu.matmul %7, %8, %cst_11 {dimension_numbers = #tpu.dot_dimension_numbers<[1], [0], [0], [1], [0, 0, 1, 1], [], []>} : vector<128x6xbf16>, vector<6x64xbf16>, vector<128x64xf32> -> vector<128x64xf32>
    %10 = arith.addf %6, %9 : vector<128x64xf32>
    %c0_12 = arith.constant 0 : index
    %c0_13 = arith.constant 0 : index
    %11 = vector.load %arg7[%c0_12, %c0_13] : memref<1x64xf32, #tpu.memory_space<vmem>>, vector<1x64xf32>
    %12 = vector.broadcast %1 : vector<128x1xf32> to vector<128x64xf32>
    %13 = vector.broadcast %11 : vector<1x64xf32> to vector<128x64xf32>
    %14 = arith.mulf %12, %13 : vector<128x64xf32>
    %c0_14 = arith.constant 0 : index
    %c0_15 = arith.constant 0 : index
    %15 = vector.load %arg8[%c0_14, %c0_15] : memref<1x64xf32, #tpu.memory_space<vmem>>, vector<1x64xf32>
    %16 = vector.broadcast %2 : vector<128x1xf32> to vector<128x64xf32>
    %17 = vector.broadcast %15 : vector<1x64xf32> to vector<128x64xf32>
    %18 = arith.mulf %16, %17 : vector<128x64xf32>
    %19 = arith.addf %14, %18 : vector<128x64xf32>
    %c0_16 = arith.constant 0 : index
    %c0_17 = arith.constant 0 : index
    %20 = vector.load %arg9[%c0_16, %c0_17] : memref<1x64xf32, #tpu.memory_space<vmem>>, vector<1x64xf32>
    %21 = vector.broadcast %20 : vector<1x64xf32> to vector<128x64xf32>
    %22 = arith.addf %19, %21 : vector<128x64xf32>
    %23 = arith.addf %10, %22 : vector<128x64xf32>
    %cst_18 = arith.constant 0.000000e+00 : f32
    %24 = vector.broadcast %cst_18 : f32 to vector<128x64xf32>
    %25 = arith.maximumf %23, %24 : vector<128x64xf32>
    %26 = arith.truncf %25 : vector<128x64xf32> to vector<128x64xbf16>
    %c0_19 = arith.constant 0 : index
    %c0_20 = arith.constant 0 : index
    %27 = vector.load %arg10[%c0_19, %c0_20] : memref<64x256xbf16, #tpu.memory_space<vmem>>, vector<64x256xbf16>
    %cst_21 = arith.constant dense<0.000000e+00> : vector<128x256xf32>
    %28 = tpu.matmul %26, %27, %cst_21 {dimension_numbers = #tpu.dot_dimension_numbers<[1], [0], [0], [1], [0, 0, 1, 1], [], []>} : vector<128x64xbf16>, vector<64x256xbf16>, vector<128x256xf32> -> vector<128x256xf32>
    %c0_22 = arith.constant 0 : index
    %c0_23 = arith.constant 0 : index
    %29 = vector.load %arg11[%c0_22, %c0_23] : memref<1x256xf32, #tpu.memory_space<vmem>>, vector<1x256xf32>
    %30 = vector.broadcast %29 : vector<1x256xf32> to vector<128x256xf32>
    %31 = arith.addf %28, %30 : vector<128x256xf32>
    %cst_24 = arith.constant 0.000000e+00 : f32
    %32 = vector.broadcast %cst_24 : f32 to vector<128x256xf32>
    %33 = arith.maximumf %31, %32 : vector<128x256xf32>
    %34 = vector.broadcast %cst_24 : f32 to vector<128x256xf32>
    %35 = arith.subf %31, %34 : vector<128x256xf32>
    %36 = arith.cmpf one, %35, %35 : vector<128x256xf32>
    %37 = vector.broadcast %cst_24 : f32 to vector<128x256xf32>
    %38 = arith.addf %31, %37 : vector<128x256xf32>
    %39 = math.absf %35 : vector<128x256xf32>
    %cst_25 = arith.constant 0.000000e+00 : f32
    %40 = vector.broadcast %cst_25 : f32 to vector<128x256xf32>
    %41 = arith.subf %40, %39 : vector<128x256xf32>
    %42 = math.exp %41 : vector<128x256xf32>
    %43 = math.log1p %42 : vector<128x256xf32>
    %44 = arith.addf %33, %43 : vector<128x256xf32>
    %45 = arith.select %36, %38, %44 : vector<128x256xi1>, vector<128x256xf32>
    %cst_26 = arith.constant 9.99999997E-7 : f32
    %46 = vector.broadcast %cst_26 : f32 to vector<128x256xf32>
    %47 = arith.addf %45, %46 : vector<128x256xf32>
    %48 = vector.extract_strided_slice %47 {offsets = [0, 0], sizes = [128, 128], strides = [1, 1]} : vector<128x256xf32> to vector<128x128xf32>
    %49 = vector.extract_strided_slice %47 {offsets = [0, 128], sizes = [128, 128], strides = [1, 1]} : vector<128x256xf32> to vector<128x128xf32>
    %50 = tpu.reciprocal %49 {approx = true} : vector<128x128xf32> -> vector<128x128xf32>
    %51 = arith.mulf %48, %50 : vector<128x128xf32>
    %52 = arith.truncf %51 : vector<128x128xf32> to vector<128x128xbf16>
    %c0_27 = arith.constant 0 : index
    %c0_28 = arith.constant 0 : index
    %53 = vector.load %arg12[%c0_27, %c0_28] : memref<128x128xbf16, #tpu.memory_space<vmem>>, vector<128x128xbf16>
    tpu.vector_store %arg12[%c0_27, %c0_28], %52 {strides = array<i32>} : memref<128x128xbf16, #tpu.memory_space<vmem>>, vector<128x128xbf16>,
    return
  }
  func.func @transform_0(%arg0: i32) -> (i32, i32) {
    %c0_i32 = arith.constant 0 : i32
    %c0_i32_0 = arith.constant 0 : i32
    return %arg0, %c0_i32 : i32, i32
  }
  func.func @transform_1(%arg0: i32) -> (i32, i32) {
    %c0_i32 = arith.constant 0 : i32
    %c0_i32_0 = arith.constant 0 : i32
    return %arg0, %c0_i32 : i32, i32
  }
  func.func @transform_2(%arg0: i32) -> (i32, i32) {
    %c0_i32 = arith.constant 0 : i32
    %c0_i32_0 = arith.constant 0 : i32
    return %arg0, %c0_i32 : i32, i32
  }
  func.func @transform_3(%arg0: i32) -> (i32, i32) {
    %c0_i32 = arith.constant 0 : i32
    %c0_i32_0 = arith.constant 0 : i32
    return %arg0, %c0_i32 : i32, i32
  }
  func.func @transform_4(%arg0: i32) -> (i32, i32) {
    %c0_i32 = arith.constant 0 : i32
    %c0_i32_0 = arith.constant 0 : i32
    %c0_i32_1 = arith.constant 0 : i32
    return %c0_i32, %c0_i32_0 : i32, i32
  }
  func.func @transform_5(%arg0: i32) -> (i32, i32) {
    %c0_i32 = arith.constant 0 : i32
    %c0_i32_0 = arith.constant 0 : i32
    %c0_i32_1 = arith.constant 0 : i32
    return %c0_i32, %c0_i32_0 : i32, i32
  }
  func.func @transform_6(%arg0: i32) -> (i32, i32) {
    %c0_i32 = arith.constant 0 : i32
    %c0_i32_0 = arith.constant 0 : i32
    %c0_i32_1 = arith.constant 0 : i32
    return %c0_i32, %c0_i32_0 : i32, i32
  }
  func.func @transform_7(%arg0: i32) -> (i32, i32) {
    %c0_i32 = arith.constant 0 : i32
    %c0_i32_0 = arith.constant 0 : i32
    %c0_i32_1 = arith.constant 0 : i32
    return %c0_i32, %c0_i32_0 : i32, i32
  }
  func.func @transform_8(%arg0: i32) -> (i32, i32) {
    %c0_i32 = arith.constant 0 : i32
    %c0_i32_0 = arith.constant 0 : i32
    %c0_i32_1 = arith.constant 0 : i32
    return %c0_i32, %c0_i32_0 : i32, i32
  }
  func.func @transform_9(%arg0: i32) -> (i32, i32) {
    %c0_i32 = arith.constant 0 : i32
    %c0_i32_0 = arith.constant 0 : i32
    %c0_i32_1 = arith.constant 0 : i32
    return %c0_i32, %c0_i32_0 : i32, i32
  }
  func.func @transform_10(%arg0: i32) -> (i32, i32) {
    %c0_i32 = arith.constant 0 : i32
    %c0_i32_0 = arith.constant 0 : i32
    %c0_i32_1 = arith.constant 0 : i32
    return %c0_i32, %c0_i32_0 : i32, i32
  }
  func.func @transform_11(%arg0: i32) -> (i32, i32) {
    %c0_i32 = arith.constant 0 : i32
    %c0_i32_0 = arith.constant 0 : i32
    return %arg0, %c0_i32 : i32, i32
  }
}

</mosaic_0001>

<bundles_post_ra>
// kernel: tpu_custom_call.1
= control target key start
LH: loop header
LB: loop body
LE: loop exit
PB: predicated region body
PF: predicated region fallthrough
CT: control target
= control target key end

     0   :  { %7 = vsyncpa [#allocation5], 0  ;;  %v9_v0 = vlaneseq  ;;  %s307_s0 = inlined_call_operand.<no memory space> [shape: s32[1], index: 0, kind: input, shape index: {}]   ;;  %s308_s1 = inlined_call_operand.hbm [shape: f32[8,128], index: 1, kind: output, shape index: {}]  }
   0x1   :  { %v270_v1 = vstv %s307_s0  ;;  %s256_s0 = smov [#allocation4]  }
   0x2   :  { %v13_v2 = vadd.s32 %v270_v1, %v9_v0  ;;  %v11_v17 = vxor.u32 %v270_v1, %v270_v1  ;;  %s200_s8 = sshll.u32 %s256_s0, 4  ;;  %s201_s8 = int_to_ptr.vmem [resolvable:$true] %s200_s8 }
   0x3   :  { %s225_s9 = scalar_lea.vmem %s201_s8, 128  ;;  %p230_p1 = scmp.lt.s32.totalorder %s201_s8, %s201_s8 }
   0x4   :  { %v14_v3 = vadd.s32 %v13_v2, %v13_v2  ;;  %v15_v4 = vshll.u32 %v13_v2, 13  ;;  %v16_v5 = vshrl.u32 %v13_v2, 19  ;;  %v275_v22 = vxor.u32 466688986, %v11_v17  ;;  %p226_p0 = scmp.ne.s32.totalorder %s201_s8, %s225_s9  ;;  %p231_p2 = scmp.lt.s32.totalorder %s225_s9, %s225_s9 }
   0x6   :  { %v17_v6 = vor.u32 %v16_v5, %v15_v4  ;;  %p232_p3 = por %p231_p2, %p230_p1 }
   0x8   :  { %v18_v7 = vxor.u32 %v17_v6, %v14_v3  ;;  %p233_p4 = pnand %p232_p3, %p226_p0 }
   0xa   :  { %v19_v8 = vadd.s32 %v18_v7, %v14_v3  ;;  %v20_v9 = vshll.u32 %v18_v7, 15  ;;  %v21_v10 = vshrl.u32 %v18_v7, 17 }
   0xc   :  { %v22_v11 = vor.u32 %v21_v10, %v20_v9 }
   0xe   :  { %v23_v12 = vxor.u32 %v22_v11, %v19_v8 }
  0x10   :  { %v24_v13 = vadd.s32 %v23_v12, %v19_v8  ;;  %v25_v14 = vshll.u32 %v23_v12, 26  ;;  %v26_v15 = vshrl.u32 %v23_v12, 6 }
  0x12   :  { %v27_v16 = vor.u32 %v26_v15, %v25_v14 }
  0x14   :  { %v28_v18 = vxor.u32 %v27_v16, %v24_v13 }
  0x16   :  { %v29_v19 = vadd.s32 %v28_v18, %v24_v13  ;;  %v30_v20 = vshll.u32 %v28_v18, 6  ;;  %v31_v21 = vshrl.u32 %v28_v18, 26 }
  0x18   :  { %v32_v23 = vor.u32 %v31_v21, %v30_v20  ;;  %v34_v25 = vadd.s32 %v29_v19, %v270_v1 }
  0x1a   :  { %v33_v24 = vxor.u32 %v32_v23, %v29_v19 }
  0x1c   :  { %v35_v26 = vadd.s32 %v33_v24, %v275_v22 }
  0x1e   :  { %v36_v27 = vadd.s32 1, %v35_v26 }
  0x20   :  { %v37_v28 = vadd.s32 %v36_v27, %v34_v25  ;;  %v38_v29 = vshll.u32 %v36_v27, 17  ;;  %v39_v30 = vshrl.u32 %v36_v27, 15 }
  0x22   :  { %v40_v31 = vor.u32 %v39_v30, %v38_v29 }
  0x24   :  { %v41_v32 = vxor.u32 %v40_v31, %v37_v28 }
  0x26   :  { %v42_v33 = vadd.s32 %v41_v32, %v37_v28  ;;  %v43_v34 = vshll.u32 %v41_v32, 29  ;;  %v44_v35 = vshrl.u32 %v41_v32, 3 }
  0x28   :  { %v45_v36 = vor.u32 %v44_v35, %v43_v34 }
  0x2a   :  { %v46_v37 = vxor.u32 %v45_v36, %v42_v33 }
  0x2c   :  { %v47_v38 = vadd.s32 %v46_v37, %v42_v33  ;;  %v48_v39 = vshll.u32 %v46_v37, 16  ;;  %v49_v40 = vshrl.u32 %v46_v37, 16 }
  0x2e   :  { %v50_v41 = vor.u32 %v49_v40, %v48_v39 }
  0x30   :  { %v51_v42 = vxor.u32 %v50_v41, %v47_v38 }
  0x32   :  { %v52_v43 = vadd.s32 %v51_v42, %v47_v38  ;;  %v53_v44 = vshll.u32 %v51_v42, 24  ;;  %v54_v45 = vshrl.u32 %v51_v42, 8 }
  0x34   :  { %v55_v46 = vor.u32 %v54_v45, %v53_v44  ;;  %v57_v48 = vadd.s32 %v52_v43, %v275_v22 }
  0x36   :  { %v56_v47 = vxor.u32 %v55_v46, %v52_v43 }
  0x38   :  { %v58_v49 = vadd.s32 %v56_v47, %v270_v1 }
  0x3a   :  { %v59_v50 = vadd.s32 2, %v58_v49 }
  0x3c   :  { %v60_v51 = vadd.s32 %v59_v50, %v57_v48  ;;  %v61_v52 = vshll.u32 %v59_v50, 13  ;;  %v62_v53 = vshrl.u32 %v59_v50, 19 }
  0x3e   :  { %v63_v54 = vor.u32 %v62_v53, %v61_v52 }
  0x40   :  { %v64_v55 = vxor.u32 %v63_v54, %v60_v51 }
  0x42   :  { %v65_v56 = vadd.s32 %v64_v55, %v60_v51  ;;  %v66_v57 = vshll.u32 %v64_v55, 15  ;;  %v67_v58 = vshrl.u32 %v64_v55, 17 }
  0x44   :  { %v68_v59 = vor.u32 %v67_v58, %v66_v57 }
  0x46   :  { %v69_v60 = vxor.u32 %v68_v59, %v65_v56 }
  0x48   :  { %v70_v61 = vadd.s32 %v69_v60, %v65_v56  ;;  %v71_v62 = vshll.u32 %v69_v60, 26  ;;  %v72_v63 = vshrl.u32 %v69_v60, 6 }
  0x4a   :  { %v73_v0 = vor.u32 %v72_v63, %v71_v62 }
  0x4c   :  { %v74_v2 = vxor.u32 %v73_v0, %v70_v61 }
  0x4e   :  { %v75_v3 = vadd.s32 %v74_v2, %v70_v61  ;;  %v76_v4 = vshll.u32 %v74_v2, 6  ;;  %v77_v5 = vshrl.u32 %v74_v2, 26 }
  0x50   :  { %v78_v6 = vor.u32 %v77_v5, %v76_v4  ;;  %v80_v8 = vadd.s32 %v75_v3, %v270_v1 }
  0x52   :  { %v79_v7 = vxor.u32 %v78_v6, %v75_v3 }
  0x54   :  { %v81_v9 = vadd.s32 %v79_v7, %v270_v1 }
  0x56   :  { %v82_v10 = vadd.s32 3, %v81_v9 }
  0x58   :  { %v83_v11 = vadd.s32 %v82_v10, %v80_v8  ;;  %v84_v12 = vshll.u32 %v82_v10, 17  ;;  %v85_v13 = vshrl.u32 %v82_v10, 15 }
  0x5a   :  { %v86_v14 = vor.u32 %v85_v13, %v84_v12 }
  0x5c   :  { %v87_v15 = vxor.u32 %v86_v14, %v83_v11 }
  0x5e   :  { %v88_v16 = vadd.s32 %v87_v15, %v83_v11  ;;  %v89_v17 = vshll.u32 %v87_v15, 29  ;;  %v90_v18 = vshrl.u32 %v87_v15, 3 }
  0x60   :  { %v91_v19 = vor.u32 %v90_v18, %v89_v17 }
  0x62   :  { %v92_v20 = vxor.u32 %v91_v19, %v88_v16 }
  0x64   :  { %v93_v21 = vadd.s32 %v92_v20, %v88_v16  ;;  %v94_v23 = vshll.u32 %v92_v20, 16  ;;  %v95_v24 = vshrl.u32 %v92_v20, 16  ;;  %v247_v20 = vmov -0.00020021426  }
  0x66   :  { %v96_v25 = vor.u32 %v95_v24, %v94_v23  ;;  %v248_v24 = vmov 0.00010095056  }
  0x68   :  { %v97_v26 = vxor.u32 %v96_v25, %v93_v21 }
  0x6a   :  { %v98_v27 = vadd.s32 %v97_v26, %v93_v21  ;;  %v99_v28 = vshll.u32 %v97_v26, 24  ;;  %v100_v29 = vshrl.u32 %v97_v26, 8 }
  0x6c   :  { %v101_v30 = vor.u32 %v100_v29, %v99_v28  ;;  %v103_v32 = vadd.s32 %v98_v27, %v270_v1  ;;  %v249_v28 = vmov 0.0013493432  }
  0x6e   :  { %v102_v31 = vxor.u32 %v101_v30, %v98_v27 }
  0x70   :  { %v104_v33 = vadd.s32 %v102_v31, %v275_v22 }
  0x72   :  { %v105_v34 = vadd.s32 4, %v104_v33 }
  0x74   :  { %v106_v35 = vadd.s32 %v105_v34, %v103_v32  ;;  %v107_v36 = vshll.u32 %v105_v34, 13  ;;  %v108_v37 = vshrl.u32 %v105_v34, 19  ;;  %v250_v32 = vmov -0.0036734284  }
  0x76   :  { %v109_v38 = vor.u32 %v108_v37, %v107_v36  ;;  %v251_v36 = vmov 0.0057395077  }
  0x78   :  { %v110_v39 = vxor.u32 %v109_v38, %v106_v35 }
  0x7a   :  { %v111_v40 = vadd.s32 %v110_v39, %v106_v35  ;;  %v112_v41 = vshll.u32 %v110_v39, 15  ;;  %v113_v42 = vshrl.u32 %v110_v39, 17 }
  0x7c   :  { %v114_v43 = vor.u32 %v113_v42, %v112_v41 }
  0x7e   :  { %v115_v44 = vxor.u32 %v114_v43, %v111_v40 }
  0x80   :  { %v116_v45 = vadd.s32 %v115_v44, %v111_v40  ;;  %v117_v46 = vshll.u32 %v115_v44, 26  ;;  %v118_v47 = vshrl.u32 %v115_v44, 6  ;;  %v252_v40 = vmov -0.0076224613  }
  0x81   :  { %v253_v44 = vmov 0.0094388705  }
  0x82   :  { %v119_v48 = vor.u32 %v118_v47, %v117_v46 }
  0x84   :  { %v120_v49 = vxor.u32 %v119_v48, %v116_v45  ;;  %v254_v48 = vmov 1.001674  }
  0x86   :  { %v121_v50 = vadd.s32 %v120_v49, %v116_v45  ;;  %v122_v51 = vshll.u32 %v120_v49, 6  ;;  %v123_v52 = vshrl.u32 %v120_v49, 26 }
  0x88   :  { %v124_v53 = vor.u32 %v123_v52, %v122_v51  ;;  %v126_v55 = vadd.s32 %v121_v50, %v275_v22  ;;  %v255_v52 = vmov 2.8329768  }
  0x8a   :  { %v125_v54 = vxor.u32 %v124_v53, %v121_v50 }
  0x8c   :  { %v127_v56 = vadd.s32 %v125_v54, %v270_v1 }
  0x8e   :  { %v128_v57 = vadd.s32 5, %v127_v56 }
  0x90   :  { %v129_v58 = vxor.u32 %v128_v57, %v126_v55 }
  0x92   :  { %130 = set.rngseed %v129_v58 }
  0x93   :  { %v131_v59 = vrng }
  0x94   :  { %v132_v60 = vshrl.u32 %v131_v59, 9 }
  0x96   :  { %v133_v61 = vor.u32 1065353216, %v132_v60 }
  0x98   :  { %v208_v62 = vadd.f32 -1.0, %v133_v61 }
  0x9a   :  { %v136_v63 = vmul.f32 2.0, %v208_v62 }
  0x9c   :  { %v137_v0 = vadd.f32 -0.99999994, %v136_v63 }
  0x9e   :  { %v287_v2 = vmax.f32 %v137_v0, -0.99999994 }
  0xa0   :  { %v139_v3 = vsub.f32 0.0, %v287_v2  ;;  %v187_v54 = vand.u32 2147483647, %v287_v2  ;;  %v189_v56 = vmul.f32 inf, %v287_v2 }
  0xa2   :  { %v140_v4 = vmul.f32 %v139_v3, %v287_v2  ;;  %vm188_vm4 = vcmp.eq.f32.partialorder %v187_v54, 1.0 }
  0xa4   :  { %v141_v5 = vadd.f32 1.0, %v140_v4  ;;  %v144_v22 = vmul.f32 -0.5, %v140_v4  ;;  %v147_v1 = vand.u32 2147483647, %v140_v4 }
  0xa6   :  { %221 = vlog2.f32 %v141_v5  ;;  %v145_v6 = vadd.f32 1.0, %v144_v22  ;;  %vm148_vm0 = vcmp.lt.f32.partialorder %v147_v1, 0.0004427343 }
  0xa8   :  { %v146_v9 = vmul.f32 %v145_v6, %v140_v4 }
  0xb3   :  { %v222_v7 = vpop.eup %221 }
  0xb4   :  { %v143_v8 = vmul.f32 0.6931472, %v222_v7 }
  0xb6   :  { %v149_v10 = vsel %vm148_vm0, %v146_v9, %v143_v8 }
  0xb7   :  { %v150_v11 = vsub.f32 0.0, %v149_v10 }
  0xb9   :  { %223 = vrsqrt.f32 %v150_v11  ;;  %vm155_vm1 = vcmp.eq.f32.partialorder %v150_v11, inf  ;;  %v158_v14 = vand.u32 2147483648, %v150_v11  ;;  %vm157_vm2 = vcmp.eq.f32.partialorder %v150_v11, 0.0 }
  0xba   :  { %vm151_vm3 = vcmp.lt.f32.partialorder %v150_v11, 5.0  ;;  %v209_v17 = vadd.f32 -2.5, %v150_v11 }
  0xbb   :  { %v162_v21 = vsel %vm151_vm3, 2.8102264e-08, %v247_v20  ;;  %v163_v25 = vsel %vm151_vm3, 3.4327394e-07, %v248_v24  ;;  %v166_v29 = vsel %vm151_vm3, -3.5233877e-06, %v249_v28 }
  0xbc   :  { %v169_v33 = vsel %vm151_vm3, -4.3915065e-06, %v250_v32  ;;  %v172_v37 = vsel %vm151_vm3, 0.00021858087, %v251_v36  ;;  %v175_v41 = vsel %vm151_vm3, -0.001253725, %v252_v40 }
  0xbd   :  { %v178_v45 = vsel %vm151_vm3, -0.0041776816, %v253_v44  ;;  %v181_v49 = vsel %vm151_vm3, 0.24664073, %v254_v48  ;;  %v184_v53 = vsel %vm151_vm3, 1.5014094, %v255_v52 }
  0xc6   :  { %v224_v12 = vpop.eup %223 }
  0xc7   :  { %v154_v13 = vmul.f32 %v224_v12, %v150_v11 }
  0xc9   :  { %v156_v15 = vsel %vm155_vm1, %v150_v11, %v154_v13 }
  0xca   :  { %v159_v16 = vsel %vm157_vm2, %v158_v14, %v156_v15 }
  0xcb   :  { %v210_v18 = vadd.f32 -3.0, %v159_v16 }
  0xcd   :  { %v161_v19 = vsel %vm151_vm3, %v209_v17, %v210_v18 }
  0xce   :  { %v164_v23 = vmul.f32 %v162_v21, %v161_v19 }
  0xd0   :  { %v165_v26 = vadd.f32 %v164_v23, %v163_v25 }
  0xd2   :  { %v167_v27 = vmul.f32 %v165_v26, %v161_v19 }
  0xd4   :  { %v168_v30 = vadd.f32 %v167_v27, %v166_v29 }
  0xd6   :  { %v170_v31 = vmul.f32 %v168_v30, %v161_v19 }
  0xd8   :  { %v171_v34 = vadd.f32 %v170_v31, %v169_v33 }
  0xda   :  { %v173_v35 = vmul.f32 %v171_v34, %v161_v19 }
  0xdc   :  { %v174_v38 = vadd.f32 %v173_v35, %v172_v37 }
  0xde   :  { %v176_v39 = vmul.f32 %v174_v38, %v161_v19 }
  0xe0   :  { %v177_v42 = vadd.f32 %v176_v39, %v175_v41 }
  0xe2   :  { %v179_v43 = vmul.f32 %v177_v42, %v161_v19 }
  0xe4   :  { %v180_v46 = vadd.f32 %v179_v43, %v178_v45 }
  0xe6   :  { %v182_v47 = vmul.f32 %v180_v46, %v161_v19 }
  0xe8   :  { %v183_v50 = vadd.f32 %v182_v47, %v181_v49 }
  0xea   :  { %v185_v51 = vmul.f32 %v183_v50, %v161_v19 }
  0xec   :  { %v186_v55 = vadd.f32 %v185_v51, %v184_v53 }
  0xee   :  { %v190_v57 = vmul.f32 %v186_v55, %v287_v2 }
  0xf0   :  { %v191_v58 = vsel %vm188_vm4, %v189_v56, %v190_v57 }
  0xf1   :  { %v192_v59 = vmul.f32 1.4142135, %v191_v58 }
  0xf3   :  { %193 = vst [vmem:[#allocation4] sm:$0xff] %v192_v59 }
  0xf4   :  { %236 = shalt.err (!%p233_p4)
}
  0xf5   :  { %203 = dma.vmem_to_hbm [thread:$0]  %s201_s8, 128, %s308_s1, [#allocation5]  }
  0xf6   :  { %245 = dma.done.wait [#allocation5], 128  }
  0xf7   :  { %246 = vsyncadd [#allocation5], 4294967168 }
  0xf8   :  { %207 = vsyncpa [#allocation5], 1 }

// kernel: tpu_custom_call.1
= control target key start
LH: loop header
LB: loop body
LE: loop exit
PB: predicated region body
PF: predicated region fallthrough
CT: control target
= control target key end

     0   :  { %s3682_s0 = inlined_call_operand.vmem [shape: f32[256,16], index: 0, kind: input, shape index: {}]   ;;  %s3683_s1 = inlined_call_operand.vmem [shape: f32[256,1], index: 1, kind: input, shape index: {}]   ;;  %s3684_s2 = inlined_call_operand.vmem [shape: f32[256,1], index: 2, kind: input, shape index: {}]   ;;  %s3685_s3 = inlined_call_operand.vmem [shape: f32[256,6], index: 3, kind: input, shape index: {}]   ;;  %s3686_s4 = inlined_call_operand.vmem [shape: bf16[16,64], index: 4, kind: input, shape index: {}]   ;;  %s3687_s5 = inlined_call_operand.vmem [shape: bf16[6,64], index: 5, kind: input, shape index: {}]   ;;  %s3688_s6 = inlined_call_operand.vmem [shape: f32[1,64], index: 6, kind: input, shape index: {}]   ;;  %s3689_s7 = inlined_call_operand.vmem [shape: f32[1,64], index: 7, kind: input, shape index: {}]   ;;  %s3690_s8 = inlined_call_operand.vmem [shape: f32[1,64], index: 8, kind: input, shape index: {}]   ;;  %s3691_s9 = inlined_call_operand.vmem [shape: bf16[64,256], index: 9, kind: input, shape index: {}]   ;;  %s3692_s10 = inlined_call_operand.vmem [shape: f32[1,256], index: 10, kind: input, shape index: {}]   ;;  %s3693_s11 = inlined_call_operand.hbm [shape: bf16[256,128], index: 11, kind: output, shape index: {}]  }
   0x1   :  { %3694 = sst [smem:[#allocation5_spill]] %s3682_s0 }
   0x2   :  { %16 = vsyncpa [#allocation3], 0 }
   0x3   :  { %18 = vsyncpa [#allocation3 + $0x1], 0  ;;  %s2647_s17 = smov 0   ;;  %s2649_s18 = smov 0  }
   0x4   :  { %s2651_s19 = smov 0   ;;  %s2653_s20 = smov 0  }
   0x5 LB: > { %s2668_s21 = sadd.s32 4294967295, %s2581_s20   ;;  %s2107_s22 = sadd.s32 4294967294, %s2581_s20   ;;  %s2581_s20 = sphi %s2653_s20, %s3737_s20   ;;  %s2577_s19 = sphi %s2651_s19, %s3736_s19   ;;  %s2573_s18 = sphi %s2649_s18, %s3735_s18   ;;  %s2569_s17 = sphi %s2647_s17, %s3734_s17  }
   0x6   : > { %s2672_s23 = sadd.s32 1, %s2581_s20   ;;  %s282_s24 = sadd.s32 1, %s2577_s19 }
   0x7   : > { %s279_s25 = ssub.s32 %s2581_s20, %s2672_s23  ;;  %p292_p0 = scmp.ne.s32.totalorder %s2577_s19, %s2573_s18 }
   0x8   : > { %p280_p1 = scmp.eq.s32.totalorder %s279_s25, 0  ;;  %p293_p2 = scmp.eq.s32.totalorder %s2668_s21, 1 }
   0x9   : > { %p298_p3 = scmp.ne.s32.totalorder %s2573_s18, %s2569_s17  ;;  %p299_p4 = scmp.eq.s32.totalorder %s2107_s22, 1 }
   0xa   : > { %s2683_s26 = scalar_select %p280_p1, %s2577_s19, %s282_s24  }
   0xb   : > { %p2685_p5 = por %p293_p2, %p292_p0  ;;  %p2689_p6 = por %p299_p4, %p298_p3 }
   0xc   : > { %p2110_p7 = scmp.ge.s32.totalorder %s2581_s20, 1  ;;  %p374_p8 = scmp.lt.s32.totalorder %s2581_s20, 3 }
   0xe   : > { %p375_p9 = pnand %p2110_p7, %p374_p8 }
   0xf   : > { %s2112_s14 = sshll.u32 (!%p375_p9), %s2668_s21, 4  ;;  %s3697_s0 = sld [smem:[#allocation5_spill]] (!%p375_p9) }
  0x10   : > { %378 = sbr.rel (%p375_p9) target bundleno = 640 (0x280), region = 64  ;;  %p430_p10 = scmp.lt.s32.totalorder (!%p375_p9), %s2112_s14, 31 }
  0x11   : > { %s2193_s16 = sshll.u32 (!%p375_p9), %s2668_s21, 10  ;;  %s2584_s12 = smov (!%p375_p9), [#allocation2]  }
  0x12   : > { %s3635_s29 = scalar_lea.hbm (!%p375_p9), %s3693_s11, %s2193_s16 }
  0x15   : > { %v537_v0 = vld [vmem:[%s3687_s5] sm:$0x7]  ;;  %vm563_vm0 = vcmask 1042432   ;;  %v2583_v1 = vmov 0   ;;  %s3739_s14 = smov (!%p430_p10, %s2112_s14), 31  ;;  %vm538_vm1 = vcmask 48128  }
  0x16   : > { %2347 = vset.pattern.permute.xlu1 %v2583_v1  ;;  %2346 = vset.pattern.permute.xlu0 %v2583_v1  ;;  %v2348_v2 = vld [vmem:[%s3686_s4] sm:$0xff]   ;;  %v565_v3 = vsel %vm563_vm0, %v537_v0, 0  ;;  %s2113_s15 = sshll.u32 %s3739_s14, 3  ;;  %vm670_vm2 = vcmask 130048   ;;  %vm1137_vm3 = vcmask 523264  }
  0x17   : > { %2303 = vmatprep.subr.msk.bf16.mxu0 %vm563_vm0, %v537_v0  ;;  %2277 = vmatprep.subr.bf16.mxu1 %v2348_v2  ;;  %s2707_s24 = scalar_lea.vmem %s3683_s1, %s2113_s15  ;;  %s2712_s30 = scalar_lea.vmem %s3685_s3, %s2113_s15 }
  0x18   : > { %2260 = vmatpush3.bf16.msra.mxu0 %v565_v3  ;;  %2278 = vmatpush3.bf16.msra.mxu1 %v2348_v2  ;;  %v479_v4 = vld [vmem:[%s2707_s24 + $0x40] sm:$0xff]  ;;  %s2720_s14 = scalar_lea.vmem %s3697_s0, %s2113_s15  ;;  %v504_v7 = vld [vmem:[%s2712_s30 + $0x8] sm:$0xff]  ;;  %v505_v12 = vld [vmem:[%s2712_s30 + $0x10] sm:$0xff]  ;;  %s2734_s25 = scalar_lea.vmem %s3684_s2, %s2113_s15 }
  0x19   : > { %v471_v5 = vld [vmem:[%s2707_s24] sm:$0xff]  ;;  %835 = vperm.xlu1 %2347, %v479_v4   ;;  %v456_v9 = vld [vmem:[%s2720_s14 + $0x8] sm:$0xff]  ;;  %v506_v13 = vld [vmem:[%s2712_s30 + $0x18] sm:$0xff] }
  0x1a   : > { %v503_v6 = vld [vmem:[%s2712_s30] sm:$0xff]  ;;  %795 = vperm.xlu0 %2346, %v471_v5   ;;  %v457_v14 = vld [vmem:[%s2720_s14 + $0x10] sm:$0xff]  ;;  %v530_v15 = vpack.c.bf16 %v506_v13, %v505_v12  ;;  %v458_v16 = vld [vmem:[%s2720_s14 + $0x18] sm:$0xff] }
  0x1b   : > { %v455_v8 = vld [vmem:[%s2720_s14] sm:$0xff]  ;;  %v529_v10 = vpack.c.bf16 %v504_v7, %v503_v6  ;;  %v480_v17 = vld [vmem:[%s2707_s24 + $0x48] sm:$0xff]  ;;  %v520_v19 = vpack.c.bf16 %v458_v16, %v457_v14  ;;  %v509_v27 = vld [vmem:[%s2712_s30 + $0x30] sm:$0xff] }
  0x1c   : > { %v519_v11 = vpack.c.bf16 %v456_v9, %v455_v8  ;;  %v472_v18 = vld [vmem:[%s2707_s24 + $0x8] sm:$0xff]  ;;  %v507_v20 = vld [vmem:[%s2712_s30 + $0x20] sm:$0xff]  ;;  %v510_v28 = vld [vmem:[%s2712_s30 + $0x38] sm:$0xff] }
  0x1d   : > { %2261 = vmatprep.mubr.msk.bf16.mxu0 %vm538_vm1, %v529_v10  ;;  %840 = vperm.xlu1 %2347, %v480_v17   ;;  %v508_v21 = vld [vmem:[%s2712_s30 + $0x28] sm:$0xff]  ;;  %v459_v22 = vld [vmem:[%s2720_s14 + $0x20] sm:$0xff]  ;;  %v461_v30 = vld [vmem:[%s2720_s14 + $0x30] sm:$0xff]  ;;  %v532_v33 = vpack.c.bf16 %v510_v28, %v509_v27 }
  0x1e   : > { %2279 = vmatprep.mubr.msk.bf16.mxu1 %vm670_vm2, %v519_v11  ;;  %2262 = vmatmul.mubr.msk.bf16.vlgmr.msra.gmra.mxu0 %vm538_vm1, %v530_v15  ;;  %v460_v23 = vld [vmem:[%s2720_s14 + $0x28] sm:$0xff]  ;;  %v531_v25 = vpack.c.bf16 %v508_v21, %v507_v20  ;;  %v487_v29 = vld [vmem:[%s2734_s25] sm:$0xff]  ;;  %v462_v31 = vld [vmem:[%s2720_s14 + $0x38] sm:$0xff] }
  0x1f   : > { %2280 = vmatmul.mubr.msk.bf16.vlgmr.msra.gmra.mxu1 %vm670_vm2, %v520_v19  ;;  %800 = vperm.xlu0 %2346, %v472_v18   ;;  %v488_v24 = vld [vmem:[%s2734_s25 + $0x8] sm:$0xff]  ;;  %v521_v26 = vpack.c.bf16 %v460_v23, %v459_v22  ;;  %v511_v32 = vld [vmem:[%s2712_s30 + $0x40] sm:$0xff]  ;;  %v522_v37 = vpack.c.bf16 %v462_v31, %v461_v30  ;;  %v474_v42 = vld [vmem:[%s2707_s24 + $0x18] sm:$0xff] }
  0x20   : > { %2265 = vmatprep.mubr.msk.bf16.mxu0 %vm538_vm1, %v531_v25  ;;  %v512_v34 = vld [vmem:[%s2712_s30 + $0x48] sm:$0xff]  ;;  %v463_v35 = vld [vmem:[%s2720_s14 + $0x40] sm:$0xff]  ;;  %v473_v43 = vld [vmem:[%s2707_s24 + $0x10] sm:$0xff] }
  0x21   : > { %2283 = vmatprep.mubr.msk.bf16.mxu1 %vm670_vm2, %v521_v26  ;;  %903 = vperm.xlu1 %2347, %v488_v24   ;;  %v464_v36 = vld [vmem:[%s2720_s14 + $0x48] sm:$0xff]  ;;  %v495_v39 = vld [vmem:[%s2734_s25 + $0x40] sm:$0xff]  ;;  %v533_v40 = vpack.c.bf16 %v512_v34, %v511_v32  ;;  %v513_v44 = vld [vmem:[%s2712_s30 + $0x50] sm:$0xff] }
  0x22   : > { %v496_v38 = vld [vmem:[%s2734_s25 + $0x48] sm:$0xff]  ;;  %v523_v41 = vpack.c.bf16 %v464_v36, %v463_v35  ;;  %v514_v45 = vld [vmem:[%s2712_s30 + $0x58] sm:$0xff]  ;;  %v465_v46 = vld [vmem:[%s2720_s14 + $0x50] sm:$0xff] }
  0x23   : > { %898 = vperm.xlu0 %2346, %v487_v29   ;;  %v466_v47 = vld [vmem:[%s2720_s14 + $0x58] sm:$0xff]  ;;  %v515_v48 = vld [vmem:[%s2712_s30 + $0x60] sm:$0xff]  ;;  %v516_v49 = vld [vmem:[%s2712_s30 + $0x68] sm:$0xff]  ;;  %v534_v52 = vpack.c.bf16 %v514_v45, %v513_v44 }
  0x24   : > { %v467_v50 = vld [vmem:[%s2720_s14 + $0x60] sm:$0xff]  ;;  %v468_v51 = vld [vmem:[%s2720_s14 + $0x68] sm:$0xff]  ;;  %v524_v53 = vpack.c.bf16 %v466_v47, %v465_v46  ;;  %v482_v54 = vld [vmem:[%s2707_s24 + $0x58] sm:$0xff]  ;;  %v535_v56 = vpack.c.bf16 %v516_v49, %v515_v48 }
  0x25   : > { %943 = vperm.xlu1 %2347, %v496_v38   ;;  %v481_v55 = vld [vmem:[%s2707_s24 + $0x50] sm:$0xff]  ;;  %v525_v57 = vpack.c.bf16 %v468_v51, %v467_v50  ;;  %v490_v58 = vld [vmem:[%s2734_s25 + $0x18] sm:$0xff]  ;;  %v476_v5 = vld [vmem:[%s2707_s24 + $0x28] sm:$0xff] }
  0x26   : > { %2266 = vmatmul.mubr.msk.bf16.gmra.mxu0 %vm538_vm1, %v532_v33  ;;  %v517_v59 = vld [vmem:[%s2712_s30 + $0x70] sm:$0xff]  ;;  %v518_v60 = vld [vmem:[%s2712_s30 + $0x78] sm:$0xff]  ;;  %v475_v6 = vld [vmem:[%s2707_s24 + $0x20] sm:$0xff] }
  0x27   : > { %2284 = vmatmul.mubr.msk.bf16.gmra.mxu1 %vm670_vm2, %v522_v37  ;;  %938 = vperm.xlu0 %2346, %v495_v39   ;;  %v489_v61 = vld [vmem:[%s2734_s25 + $0x10] sm:$0xff]  ;;  %v470_v63 = vld [vmem:[%s2720_s14 + $0x78] sm:$0xff]  ;;  %v536_v0 = vpack.c.bf16 %v518_v60, %v517_v59  ;;  %v484_v7 = vld [vmem:[%s2707_s24 + $0x68] sm:$0xff] }
  0x28   : > { %2269 = vmatprep.mubr.msk.bf16.mxu0 %vm538_vm1, %v533_v40  ;;  %2287 = vmatprep.mubr.msk.bf16.mxu1 %vm670_vm2, %v523_v41  ;;  %v469_v62 = vld [vmem:[%s2720_s14 + $0x70] sm:$0xff]  ;;  %v498_v3 = vld [vmem:[%s2734_s25 + $0x58] sm:$0xff]  ;;  %v483_v8 = vld [vmem:[%s2707_s24 + $0x60] sm:$0xff] }
  0x29   : > { %810 = vperm.xlu1 %2347, %v474_v42   ;;  %v526_v2 = vpack.c.bf16 %v470_v63, %v469_v62  ;;  %v497_v4 = vld [vmem:[%s2734_s25 + $0x50] sm:$0xff]  ;;  %v492_v9 = vld [vmem:[%s2734_s25 + $0x28] sm:$0xff]  ;;  %v491_v10 = vld [vmem:[%s2734_s25 + $0x20] sm:$0xff] }
  0x2a   : > { %v500_v11 = vld [vmem:[%s2734_s25 + $0x68] sm:$0xff]  ;;  %v499_v12 = vld [vmem:[%s2734_s25 + $0x60] sm:$0xff]  ;;  %v478_v13 = vld [vmem:[%s2707_s24 + $0x38] sm:$0xff] }
  0x2b   : > { %805 = vperm.xlu0 %2346, %v473_v43   ;;  %v477_v14 = vld [vmem:[%s2707_s24 + $0x30] sm:$0xff]  ;;  %v486_v15 = vld [vmem:[%s2707_s24 + $0x78] sm:$0xff]  ;;  %v2354_v23 = vld [vmem:[%s3691_s9 + $0x24] ss:$8 sps:$4 sm:$0xff]  }
  0x2c   : > { %v485_v16 = vld [vmem:[%s2707_s24 + $0x70] sm:$0xff]  ;;  %v494_v17 = vld [vmem:[%s2734_s25 + $0x38] sm:$0xff]  ;;  %v2352_v24 = vld [vmem:[%s3691_s9 + $0x20] ss:$8 sps:$4 sm:$0xff]   ;;  %s426_s24 = sand.u32 1, %s2573_s18  }
  0x2d   : > { %850 = vperm.xlu1 %2347, %v482_v54   ;;  %v493_v18 = vld [vmem:[%s2734_s25 + $0x30] sm:$0xff]  ;;  %v502_v19 = vld [vmem:[%s2734_s25 + $0x78] sm:$0xff]  ;;  %v2360_v27 = vld [vmem:[%s3691_s9 + $0x4] ss:$8 sps:$4 sm:$0xff]   ;;  %s2111_s13 = sshll.u32 %s426_s24, 6  ;;  %s3642_s30 = scalar_lea.sflag [#allocation3], %s426_s24 }
  0x2e   : > { %2270 = vmatmul.mubr.msk.bf16.gmra.mxu0 %vm538_vm1, %v534_v52  ;;  %v501_v20 = vld [vmem:[%s2734_s25 + $0x70] sm:$0xff]  ;;  %v2358_v28 = vld [vmem:[%s3691_s9] ss:$8 sps:$4 sm:$0xff]   ;;  %s3177_s14 = scalar_lea.vmem [#allocation2], %s2111_s13  ;;  %s2525_s13 = sshll.u32 %s2584_s12, 4  ;;  %s2526_s13 = int_to_ptr.vmem [resolvable:$false] %s2525_s13 }
  0x2f   : > { %2288 = vmatmul.mubr.msk.bf16.gmra.mxu1 %vm670_vm2, %v524_v53  ;;  %845 = vperm.xlu0 %2346, %v481_v55   ;;  %v2349_v21 = vld [vmem:[%s3691_s9 + $0x30] ss:$8 sps:$4 sm:$0xff]   ;;  %v2351_v22 = vld [vmem:[%s3691_s9 + $0x34] ss:$8 sps:$4 sm:$0xff]   ;;  %v2853_v51 = vld [vmem:[%s3688_s6] ss:$0 sm:$0xff] }
  0x30   : > { %2273 = vmatprep.mubr.msk.bf16.mxu0 %vm538_vm1, %v535_v56  ;;  %2291 = vmatprep.mubr.msk.bf16.mxu1 %vm670_vm2, %v525_v57  ;;  %v2357_v25 = vld [vmem:[%s3691_s9 + $0x14] ss:$8 sps:$4 sm:$0xff]   ;;  %v2355_v26 = vld [vmem:[%s3691_s9 + $0x10] ss:$8 sps:$4 sm:$0xff]   ;;  %v2858_v52 = vld [vmem:[%s3689_s7] ss:$0 sm:$0xff] }
  0x31   : > { %913 = vperm.xlu1 %2347, %v490_v58   ;;  %1170 = vmatprep.subr.bf16.mxu0 %v2351_v22  ;;  %s2009_s22 = sshll.u32 %s3177_s14, 4  ;;  %s2527_s16 = scalar_lea.vmem %s2526_s13, 2048  ;;  %s3637_s22 = int_to_ptr.vmem [resolvable:$true] %s2009_s22 }
  0x32   : > { %2295 = vmatprep.subr.bf16.mxu1 %v2351_v22  ;;  %1171 = vmatpush1.bf16.msra.mxu0 %v2349_v21  ;;  %s2521_s21 = scalar_lea.vmem %s3637_s22, 1024  ;;  %p2528_p0 = scmp.lt.s32.totalorder %s3637_s22, %s2526_s13 }
  0x33   : > { %908 = vperm.xlu0 %2346, %v489_v61   ;;  %2299 = vmatpush1.bf16.msra.mxu1 %v2349_v21  ;;  %p2522_p11 = scmp.ne.s32.totalorder %s3637_s22, %s2521_s21  ;;  %p2529_p1 = scmp.lt.s32.totalorder %s2527_s16, %s2521_s21 }
  0x34   : > { %1172 = vmatprep.subr.bf16.mxu0 %v2354_v23  ;;  %2296 = vmatprep.subr.bf16.mxu1 %v2354_v23 }
  0x35   : > { %953 = vperm.xlu1 %2347, %v498_v3   ;;  %p2523_p12 = pnand %p2522_p11, %p2685_p5  ;;  %p2530_p2 = por %p2529_p1, %p2528_p0 }
  0x36   : > { %2274 = vmatmul.mubr.msk.bf16.gmra.mxu0 %vm538_vm1, %v536_v0 }
  0x37   : > { %2292 = vmatmul.mubr.msk.bf16.gmra.mxu1 %vm670_vm2, %v526_v2  ;;  %948 = vperm.xlu0 %2346, %v497_v4   ;;  %v2873_v2 = vld [vmem:[%s3690_s8] ss:$0 sm:$0xff]  ;;  %p2524_p13 = pneg %p2523_p12 }
  0x38   : > { %1194 = vmatprep.mubr.bf16.mxu0 %v2583_v1  ;;  %1234 = vmatprep.mubr.bf16.mxu1 %v2583_v1 }
  0x39   : > { %820 = vperm.xlu1 %2347, %v476_v5   ;;  %1173 = vmatpush1.bf16.msra.mxu0 %v2352_v24  ;;  %p2531_p3 = pnand %p2530_p2, %p2524_p13 }
  0x3a   : > { %2300 = vmatpush1.bf16.msra.mxu1 %v2352_v24  ;;  %1174 = vmatprep.subr.bf16.mxu0 %v2357_v25 }
  0x3b   : > { %815 = vperm.xlu0 %2346, %v475_v6   ;;  %2297 = vmatprep.subr.bf16.mxu1 %v2357_v25 }
  0x3d   : > { %860 = vperm.xlu1 %2347, %v484_v7   ;;  %1175 = vmatpush1.bf16.msra.mxu0 %v2355_v26 }
  0x3e   : > { %2301 = vmatpush1.bf16.msra.mxu1 %v2355_v26  ;;  %1176 = vmatprep.subr.bf16.mxu0 %v2360_v27 }
  0x3f   : > { %855 = vperm.xlu0 %2346, %v483_v8   ;;  %2298 = vmatprep.subr.bf16.mxu1 %v2360_v27 }
  0x41   : > { %923 = vperm.xlu1 %2347, %v492_v9   ;;  %1177 = vmatpush1.bf16.msra.mxu0 %v2358_v28 }
  0x42   : > { %2302 = vmatpush1.bf16.msra.mxu1 %v2358_v28 }
  0x43   : > { %918 = vperm.xlu0 %2346, %v491_v10  }
  0x45   : > { %963 = vperm.xlu1 %2347, %v500_v11  }
  0x47   : > { %958 = vperm.xlu0 %2346, %v499_v12  }
  0x49   : > { %830 = vperm.xlu1 %2347, %v478_v13  }
  0x4b   : > { %825 = vperm.xlu0 %2346, %v477_v14  }
  0x4d   : > { %870 = vperm.xlu1 %2347, %v486_v15  }
  0x4f   : > { %865 = vperm.xlu0 %2346, %v485_v16  }
  0x51   : > { %933 = vperm.xlu1 %2347, %v494_v17  }
  0x53   : > { %928 = vperm.xlu0 %2346, %v493_v18  }
  0x55   : > { %973 = vperm.xlu1 %2347, %v502_v19  }
  0x57   : > { %968 = vperm.xlu0 %2346, %v501_v20  }
  0x94   : > { %v2830_v29 = vpop.permute.xlu1 %835 }
  0x95   : > { %v796_v30 = vpop.permute.xlu0 %795 }
  0x96   : > { %v879_v53 = vmul.f32 %v2853_v51, %v796_v30 }
  0x98   : > { %v2832_v31 = vpop.permute.xlu1 %840 }
  0x9a   : > { %v801_v32 = vpop.permute.xlu0 %800 }
  0x9b   : > { %v880_v56 = vmul.f32 %v2853_v51, %v801_v32 }
  0x9c   : > { %v904_v33 = vpop.permute.xlu1 %903 }
  0x9d   : > { %v983_v57 = vmul.f32 %v2858_v52, %v904_v33 }
  0x9e   : > { %v899_v34 = vpop.permute.xlu0 %898 }
  0x9f   : > { %v982_v54 = vmul.f32 %v2858_v52, %v899_v34  ;;  %v999_v4 = vadd.f32 %v983_v57, %v880_v56 }
  0xa0   : > { %v2834_v35 = vpop.permute.xlu1 %943 }
  0xa1   : > { %v998_v61 = vadd.f32 %v982_v54, %v879_v53  ;;  %v1022_v18 = vadd.f32 %v2873_v2, %v999_v4 }
  0xa2   : > { %v2836_v36 = vpop.permute.xlu0 %938 }
  0xa3   : > { %v1021_v12 = vadd.f32 %v2873_v2, %v998_v61 }
  0xa4   : > { %v811_v37 = vpop.permute.xlu1 %810 }
  0xa5   : > { %v882_v63 = vmul.f32 %v2853_v51, %v811_v37 }
  0xa6   : > { %v806_v38 = vpop.permute.xlu0 %805 }
  0xa7   : > { %v881_v8 = vmul.f32 %v2853_v51, %v806_v38 }
  0xa8   : > { %v2838_v39 = vpop.permute.xlu1 %850 }
  0xaa   : > { %v2840_v40 = vpop.permute.xlu0 %845 }
  0xac   : > { %v914_v41 = vpop.permute.xlu1 %913 }
  0xad   : > { %v985_v0 = vmul.f32 %v2858_v52, %v914_v41  ;;  %v887_v41 = vmul.f32 %v2853_v51, %v2830_v29  ;;  %v991_v29 = vmul.f32 %v2858_v52, %v2834_v35 }
  0xae   : > { %v909_v42 = vpop.permute.xlu0 %908 }
  0xaf   : > { %v984_v9 = vmul.f32 %v2858_v52, %v909_v42  ;;  %v1001_v14 = vadd.f32 %v985_v0, %v882_v63  ;;  %v990_v42 = vmul.f32 %v2858_v52, %v2836_v36 }
  0xb0   : > { %v2842_v43 = vpop.permute.xlu1 %953 }
  0xb1   : > { %v1000_v20 = vadd.f32 %v984_v9, %v881_v8  ;;  %v1024_v27 = vadd.f32 %v2873_v2, %v1001_v14 }
  0xb2   : > { %v2844_v44 = vpop.permute.xlu0 %948 }
  0xb3   : > { %v1023_v53 = vadd.f32 %v2873_v2, %v1000_v20 }
  0xb4   : > { %v821_v45 = vpop.permute.xlu1 %820 }
  0xb5   : > { %v884_v26 = vmul.f32 %v2853_v51, %v821_v45 }
  0xb6   : > { %v816_v46 = vpop.permute.xlu0 %815 }
  0xb7   : > { %v883_v54 = vmul.f32 %v2853_v51, %v816_v46  ;;  %v890_v46 = vmul.f32 %v2853_v51, %v2838_v39 }
  0xb8   : > { %v2846_v47 = vpop.permute.xlu1 %860 }
  0xba   : > { %v2848_v48 = vpop.permute.xlu0 %855 }
  0xbc   : > { %v924_v49 = vpop.permute.xlu1 %923 }
  0xbd   : > { %v987_v30 = vmul.f32 %v2858_v52, %v924_v49 }
  0xbe   : > { %v919_v50 = vpop.permute.xlu0 %918 }
  0xbf   : > { %v986_v49 = vmul.f32 %v2858_v52, %v919_v50  ;;  %v993_v50 = vmul.f32 %v2858_v52, %v2842_v43 }
  0xc0   : > { %v2862_v55 = vpop.permute.xlu1 %963 }
  0xc1   : > { %v1002_v4 = vadd.f32 %v986_v49, %v883_v54 }
  0xc2   : > { %v2866_v58 = vpop.permute.xlu0 %958 }
  0xc4   : > { %v2875_v5 = vpop.permute.xlu1 %830 }
  0xc5   : > { %v886_v20 = vmul.f32 %v2853_v51, %v2875_v5 }
  0xc6   : > { %v2879_v11 = vpop.permute.xlu0 %825 }
  0xc8   : > { %v2887_v22 = vpop.permute.xlu1 %870 }
  0xca   : > { %v2892_v32 = vpop.permute.xlu0 %865 }
  0xcc   : > { %v934_v36 = vpop.permute.xlu1 %933 }
  0xde   : > { %v2263_v59 = vpop.f32.mrf.mxu0 }
  0xdf   : > { %v2281_v60 = vpop.f32.mrf.mxu1 }
  0xe0   : > { %v601_v62 = vpop.f32.mrf.mxu0  ;;  %v738_v33 = vadd.f32 %v2281_v60, %v2263_v59  ;;  %v888_v60 = vmul.f32 %v2853_v51, %v2832_v31  ;;  %v1006_v31 = vadd.f32 %v990_v42, %v887_v41 }
  0xe1   : > { %v729_v3 = vpop.f32.mrf.mxu1 }
  0xe2   : > { %v730_v6 = vadd.f32 %v729_v3, %v601_v62  ;;  %v2264_v7 = vpop.f32.mrf.mxu0  ;;  %v1003_v62 = vadd.f32 %v987_v30, %v884_v26  ;;  %v1039_v63 = vadd.f32 %v1023_v53, %v738_v33  ;;  %v1007_v9 = vadd.f32 %v991_v29, %v888_v60 }
  0xe3   : > { %v2282_v10 = vpop.f32.mrf.mxu1  ;;  %v1025_v26 = vadd.f32 %v2873_v2, %v1002_v4  ;;  %v885_v30 = vmul.f32 %v2853_v51, %v2879_v11 }
  0xe4   : > { %v604_v13 = vpop.f32.mrf.mxu0  ;;  %v1037_v16 = vadd.f32 %v1021_v12, %v730_v6  ;;  %v741_v23 = vadd.f32 %v2282_v10, %v2264_v7  ;;  %v929_v6 = vpop.permute.xlu0 %928  ;;  %v889_v10 = vmul.f32 %v2853_v51, %v2840_v40  ;;  %v989_v12 = vmul.f32 %v2858_v52, %v934_v36 }
  0xe5   : > { %v732_v15 = vpop.f32.mrf.mxu1  ;;  %v1055_v39 = vmax.f32 %v1039_v63, 0.0  ;;  %v1026_v43 = vadd.f32 %v2873_v2, %v1003_v62  ;;  %v1030_v5 = vadd.f32 %v2873_v2, %v1007_v9  ;;  %v995_v62 = vmul.f32 %v2858_v52, %v2862_v55 }
  0xe6   : > { %v733_v17 = vadd.f32 %v732_v15, %v604_v13  ;;  %v2883_v19 = vpop.f32.mrf.mxu0  ;;  %v1053_v34 = vmax.f32 %v1037_v16, 0.0  ;;  %v1040_v56 = vadd.f32 %v1024_v27, %v741_v23  ;;  %v988_v23 = vmul.f32 %v2858_v52, %v929_v6 }
  0xe7   : > { %v2885_v21 = vpop.f32.mrf.mxu1  ;;  %v1005_v33 = vadd.f32 %v989_v12, %v886_v20  ;;  %v891_v6 = vmul.f32 %v2853_v51, %v2848_v48 }
  0xe8   : > { %v1038_v24 = vadd.f32 %v1022_v18, %v733_v17  ;;  %v617_v25 = vpop.f32.mrf.mxu0  ;;  %v1056_v35 = vmax.f32 %v1040_v56, 0.0  ;;  %v1009_v17 = vadd.f32 %v993_v50, %v890_v46  ;;  %v992_v18 = vmul.f32 %v2858_v52, %v2844_v44 }
  0xe9   : > { %v745_v28 = vpop.f32.mrf.mxu1  ;;  %v1004_v54 = vadd.f32 %v988_v23, %v885_v30  ;;  %v754_v36 = vadd.f32 %v2885_v21, %v2883_v19  ;;  %v1028_v63 = vadd.f32 %v2873_v2, %v1005_v33  ;;  %v893_v30 = vmul.f32 %v2853_v51, %v2892_v32 }
  0xea   : > { %v1054_v37 = vmax.f32 %v1038_v24, 0.0  ;;  %v2268_v38 = vpop.f32.mrf.mxu0  ;;  %v746_v14 = vadd.f32 %v745_v28, %v617_v25  ;;  %v1070_v40 = vpack.c.bf16 %v1056_v35, %v1055_v39  ;;  %v1029_v25 = vadd.f32 %v2873_v2, %v1006_v31 }
  0xeb   : > { %v2286_v45 = vpop.f32.mrf.mxu1  ;;  %v1008_v53 = vadd.f32 %v992_v18, %v889_v10  ;;  %v1032_v49 = vadd.f32 %v2873_v2, %v1009_v17  ;;  %v1027_v35 = vadd.f32 %v2873_v2, %v1004_v54 }
  0xec   : > { %v1069_v57 = vpack.c.bf16 %v1054_v37, %v1053_v34  ;;  %v620_v59 = vpop.f32.mrf.mxu0  ;;  %v1041_v37 = vadd.f32 %v1025_v26, %v746_v14 }
  0xed   : > { %v748_v61 = vpop.f32.mrf.mxu1  ;;  %v1031_v55 = vadd.f32 %v2873_v2, %v1008_v53  ;;  %v1043_v12 = vadd.f32 %v1027_v35, %v754_v36 }
  0xee   : > { %2148 = vmatmul.mubr.msk.bf16.vlgmr.msra.gmra.mxu0 %vm1137_vm3, %v1069_v57  ;;  %v2271_v0 = vpop.f32.mrf.mxu0  ;;  %v749_v7 = vadd.f32 %v748_v61, %v620_v59  ;;  %v757_v57 = vadd.f32 %v2286_v45, %v2268_v38  ;;  %v892_v61 = vmul.f32 %v2853_v51, %v2846_v47  ;;  %v1057_v50 = vmax.f32 %v1041_v37, 0.0 }
  0xef   : > { %v2289_v3 = vpop.f32.mrf.mxu1  ;;  %1204 = vmatprep.mubr.bf16.mxu0 %v2583_v1  ;;  %v994_v47 = vmul.f32 %v2858_v52, %v2866_v58  ;;  %v974_v58 = vpop.permute.xlu1 %973  ;;  %v1059_v18 = vmax.f32 %v1043_v12, 0.0 }
  0xf0   : > { %v633_v8 = vpop.f32.mrf.mxu0  ;;  %v1042_v27 = vadd.f32 %v1026_v43, %v749_v7  ;;  %v770_v31 = vadd.f32 %v2289_v3, %v2271_v0  ;;  %v1044_v19 = vadd.f32 %v1028_v63, %v757_v57  ;;  %v1011_v10 = vadd.f32 %v995_v62, %v892_v61 }
  0xf1   : > { %v761_v13 = vpop.f32.mrf.mxu1  ;;  %v1010_v48 = vadd.f32 %v994_v47, %v891_v6  ;;  %v997_v17 = vmul.f32 %v2858_v52, %v974_v58 }
  0xf2   : > { %v762_v15 = vadd.f32 %v761_v13, %v633_v8  ;;  %v2272_v16 = vpop.f32.mrf.mxu0  ;;  %v1058_v11 = vmax.f32 %v1042_v27, 0.0  ;;  %v1047_v13 = vadd.f32 %v1031_v55, %v770_v31  ;;  %v1060_v39 = vmax.f32 %v1044_v19, 0.0 }
  0xf3   : > { %v2290_v24 = vpop.f32.mrf.mxu1 }
  0xf4   : > { %v636_v28 = vpop.f32.mrf.mxu0  ;;  %v1045_v44 = vadd.f32 %v1029_v25, %v762_v15  ;;  %v773_v59 = vadd.f32 %v2290_v24, %v2272_v16  ;;  %v1071_v21 = vpack.c.bf16 %v1058_v11, %v1057_v50  ;;  %v969_v15 = vpop.permute.xlu0 %968  ;;  %v1034_v16 = vadd.f32 %v2873_v2, %v1011_v10 }
  0xf5   : > { %v764_v34 = vpop.f32.mrf.mxu1  ;;  %v1063_v20 = vmax.f32 %v1047_v13, 0.0  ;;  %v894_v24 = vmul.f32 %v2853_v51, %v2887_v22  ;;  %v996_v26 = vmul.f32 %v2858_v52, %v969_v15  ;;  %v1072_v27 = vpack.c.bf16 %v1060_v39, %v1059_v18 }
  0xf6   : > { %v765_v41 = vadd.f32 %v764_v34, %v636_v28  ;;  %2149 = vmatmul.mubr.msk.bf16.gmra.mxu0 %vm1137_vm3, %v1070_v40  ;;  %v2926_v42 = vpop.f32.mrf.mxu0  ;;  %v1061_v4 = vmax.f32 %v1045_v44, 0.0  ;;  %v1048_v8 = vadd.f32 %v1032_v49, %v773_v59  ;;  %v1033_v40 = vadd.f32 %v2873_v2, %v1010_v48 }
  0xf7   : > { %v2293_v56 = vpop.f32.mrf.mxu1  ;;  %1214 = vmatprep.mubr.bf16.mxu0 %v2583_v1  ;;  %v1013_v33 = vadd.f32 %v997_v17, %v894_v24  ;;  %v1012_v37 = vadd.f32 %v996_v26, %v893_v30  ;;  %v1087_v59 = vlaneseq }
  0xf8   : > { %v1046_v60 = vadd.f32 %v1030_v5, %v765_v41  ;;  %v649_v29 = vpop.f32.mrf.mxu0  ;;  %v1064_v14 = vmax.f32 %v1048_v8, 0.0  ;;  %v786_v41 = vadd.f32 %v2293_v56, %v2926_v42  ;;  %v1085_v56 = vld [vmem:[%s3692_s10] sm:$0x3] }
  0xf9   : > { %v777_v46 = vpop.f32.mrf.mxu1  ;;  %v1036_v5 = vadd.f32 %v2873_v2, %v1013_v33  ;;  %v1035_v53 = vadd.f32 %v2873_v2, %v1012_v37 }
  0xfa   : > { %v1062_v38 = vmax.f32 %v1046_v60, 0.0  ;;  %v2276_v45 = vpop.f32.mrf.mxu0  ;;  %v778_v23 = vadd.f32 %v777_v46, %v649_v29  ;;  %v1074_v25 = vpack.c.bf16 %v1064_v14, %v1063_v20  ;;  %v1088_v60 = vshrl.u32 %v1087_v59, 7 }
  0xfb   : > { %v2294_v7 = vpop.f32.mrf.mxu1  ;;  %v1051_v32 = vadd.f32 %v1035_v53, %v786_v41 }
  0xfc   : > { %v1073_v9 = vpack.c.bf16 %v1062_v38, %v1061_v4  ;;  %v652_v0 = vpop.f32.mrf.mxu0  ;;  %v1049_v34 = vadd.f32 %v1033_v40, %v778_v23  ;;  %v789_v22 = vadd.f32 %v2294_v7, %v2276_v45  ;;  %v1089_v42 = vsub.s32 0, %v1088_v60 }
  0xfd   : > { %v780_v3 = vpop.f32.mrf.mxu1  ;;  %v1067_v57 = vmax.f32 %v1051_v32, 0.0  ;;  %v1093_v2 = vsub.s32 1, %v1088_v60 }
  0xfe   : > { %2150 = vmatmul.mubr.msk.bf16.gmra.mxu0 %vm1137_vm3, %v1071_v21  ;;  %2152 = vmatmul.mubr.msk.bf16.vlgmr.msra.gmra.mxu1 %vm1137_vm3, %v1073_v9  ;;  %v781_v43 = vadd.f32 %v780_v3, %v652_v0  ;;  %v1065_v52 = vmax.f32 %v1049_v34, 0.0  ;;  %v1052_v54 = vadd.f32 %v1036_v5, %v789_v22  ;;  %v2967_v29 = vrot.slane %v1085_v56, %v1089_v42 }
  0xff   : > { %1224 = vmatprep.mubr.bf16.mxu0 %v2583_v1  ;;  %1244 = vmatprep.mubr.bf16.mxu1 %v2583_v1  ;;  %v2969_v61 = vrot.slane %v1085_v56, %v1093_v2 }
 0x100   : > { %v1050_v28 = vadd.f32 %v1034_v16, %v781_v43  ;;  %v1068_v49 = vmax.f32 %v1052_v54, 0.0 }
 0x102   : > { %v1066_v44 = vmax.f32 %v1050_v28, 0.0  ;;  %v1076_v11 = vpack.c.bf16 %v1068_v49, %v1067_v57 }
 0x104   : > { %v1075_v51 = vpack.c.bf16 %v1066_v44, %v1065_v52 }
 0x106   : > { %2151 = vmatmul.mubr.msk.bf16.gmra.mxu0 %vm1137_vm3, %v1072_v27  ;;  %2153 = vmatmul.mubr.msk.bf16.gmra.mxu1 %vm1137_vm3, %v1074_v25 }
 0x107   : > { %1254 = vmatprep.mubr.bf16.mxu1 %v2583_v1 }
 0x10e   : > { %2154 = vmatmul.mubr.msk.bf16.gmra.mxu1 %vm1137_vm3, %v1075_v51 }
 0x10f   : > { %1264 = vmatprep.mubr.bf16.mxu1 %v2583_v1 }
 0x116   : > { %2155 = vmatmul.mubr.msk.bf16.gmra.mxu1 %vm1137_vm3, %v1076_v11 }
 0x1ae   : > { %v1196_v62 = vpop.f32.mrf.mxu0 }
 0x1af   : > { %v2972_v1 = vadd.f32 %v1196_v62, %v2967_v29 }
 0x1b0   : > { %v1198_v36 = vpop.f32.mrf.mxu0 }
 0x1b1   : > { %v1371_v63 = vand.u32 2147483647, %v2972_v1  ;;  %v2976_v46 = vadd.f32 %v1198_v36, %v2969_v61  ;;  %v1275_v2 = vmax.f32 %v2972_v1, 0.0  ;;  %vm1307_vm11 = vcmp.ne.f32.partialorder %v2972_v1, %v2972_v1 }
 0x1b2   : > { %v1200_v50 = vpop.f32.mrf.mxu0 }
 0x1b3   : > { %v1372_v31 = vand.u32 2147483647, %v2976_v46  ;;  %v1403_v4 = vsub.f32 0.0, %v1371_v63  ;;  %v2980_v38 = vadd.f32 %v1200_v50, %v2967_v29  ;;  %v1276_v63 = vmax.f32 %v2976_v46, 0.0 }
 0x1b4   : > { %v1202_v45 = vpop.f32.mrf.mxu0  ;;  %vm1308_vm4 = vcmp.ne.f32.partialorder %v2976_v46, %v2976_v46 }
 0x1b5   : > { %v1404_v6 = vsub.f32 0.0, %v1372_v31  ;;  %v2983_v47 = vadd.f32 %v1202_v45, %v2969_v61  ;;  %v1373_v35 = vand.u32 2147483647, %v2980_v38  ;;  %v1435_v19 = vmul.f32 1.442695, %v1403_v4 }
 0x1b6   : > { %v1206_v55 = vpop.f32.mrf.mxu0  ;;  %vm1309_vm12 = vcmp.ne.f32.partialorder %v2980_v38, %v2980_v38 }
 0x1b7   : > { %v1437_v7 = vmul.f32 1.442695, %v1404_v6  ;;  %v1405_v21 = vsub.f32 0.0, %v1373_v35  ;;  %v1374_v8 = vand.u32 2147483647, %v2983_v47  ;;  %v2988_v9 = vadd.f32 %v1206_v55, %v2967_v29 }
 0x1b8   : > { %v1208_v10 = vpop.f32.mrf.mxu0  ;;  %v1277_v6 = vmax.f32 %v2980_v38, 0.0  ;;  %vm1310_vm6 = vcmp.ne.f32.partialorder %v2983_v47, %v2983_v47 }
 0x1b9   : > { %2361 = vpow2.f32 %v1437_v7  ;;  %v2991_v0 = vadd.f32 %v1208_v10, %v2969_v61  ;;  %v1439_v3 = vmul.f32 1.442695, %v1405_v21  ;;  %v1406_v12 = vsub.f32 0.0, %v1374_v8 }
 0x1ba   : > { %v1210_v13 = vpop.f32.mrf.mxu0  ;;  %v1375_v48 = vand.u32 2147483647, %v2988_v9  ;;  %2363 = vpow2.f32 %v1435_v19  ;;  %v1278_v7 = vmax.f32 %v2983_v47, 0.0  ;;  %vm1311_vm2 = vcmp.ne.f32.partialorder %v2988_v9, %v2988_v9 }
 0x1bb   : > { %v1376_v58 = vand.u32 2147483647, %v2991_v0  ;;  %v1441_v39 = vmul.f32 1.442695, %v1406_v12  ;;  %v2996_v14 = vadd.f32 %v1210_v13, %v2967_v29  ;;  %2365 = vpow2.f32 %v1439_v3 }
 0x1bc   : > { %v1212_v43 = vpop.f32.mrf.mxu0  ;;  %v1407_v15 = vsub.f32 0.0, %v1375_v48  ;;  %v1280_v10 = vmax.f32 %v2991_v0, 0.0  ;;  %vm1312_vm7 = vcmp.ne.f32.partialorder %v2991_v0, %v2991_v0 }
 0x1bd   : > { %v1408_v16 = vsub.f32 0.0, %v1376_v58  ;;  %v2999_v17 = vadd.f32 %v1212_v43, %v2969_v61  ;;  %2367 = vpow2.f32 %v1441_v39  ;;  %v1377_v18 = vand.u32 2147483647, %v2996_v14 }
 0x1be   : > { %v1443_v23 = vmul.f32 1.442695, %v1407_v15  ;;  %v1216_v25 = vpop.f32.mrf.mxu0  ;;  %v1236_v22 = vpop.f32.mrf.mxu1  ;;  %vm1313_vm3 = vcmp.ne.f32.partialorder %v2996_v14, %v2996_v14 }
 0x1bf   : > { %v1445_v20 = vmul.f32 1.442695, %v1408_v16  ;;  %v1409_v24 = vsub.f32 0.0, %v1377_v18  ;;  %v1378_v40 = vand.u32 2147483647, %v2999_v17  ;;  %v3016_v51 = vadd.f32 %v1216_v25, %v2967_v29 }
 0x1c0   : > { %v1218_v34 = vpop.f32.mrf.mxu0  ;;  %v1238_v32 = vpop.f32.mrf.mxu1  ;;  %v3019_v49 = vadd.f32 %v1236_v22, %v2967_v29  ;;  %v1282_v3 = vmax.f32 %v2999_v17, 0.0  ;;  %vm1314_vm15 = vcmp.ne.f32.partialorder %v2999_v17, %v2999_v17 }
 0x1c1   : > { %2369 = vpow2.f32 %v1445_v20  ;;  %v1447_v26 = vmul.f32 1.442695, %v1409_v24  ;;  %v1410_v27 = vsub.f32 0.0, %v1378_v40  ;;  %v3008_v41 = vadd.f32 %v1218_v34, %v2969_v61 }
 0x1c2   : > { %2371 = vpow2.f32 %v1443_v23  ;;  %v3026_v42 = vadd.f32 %v1238_v32, %v2969_v61  ;;  %v1379_v62 = vand.u32 2147483647, %v3016_v51  ;;  %v1387_v50 = vand.u32 2147483647, %v3019_v49 }
 0x1c3   : > { %v1449_v28 = vmul.f32 1.442695, %v1410_v27  ;;  %2373 = vpow2.f32 %v1447_v26  ;;  %v1380_v57 = vand.u32 2147483647, %v3008_v41 }
 0x1c4   : > { %v1388_v21 = vand.u32 2147483647, %v3026_v42  ;;  %v1411_v12 = vsub.f32 0.0, %v1379_v62  ;;  %v1419_v58 = vsub.f32 0.0, %v1387_v50 }
 0x1c5   : > { %2375 = vpow2.f32 %v1449_v28  ;;  %v1412_v31 = vsub.f32 0.0, %v1380_v57 }
 0x1c6   : > { %v2362_v30 = vpop.eup %2361  ;;  %v1420_v24 = vsub.f32 0.0, %v1388_v21  ;;  %v1451_v27 = vmul.f32 1.442695, %v1411_v12 }
 0x1c7   : > { %v1508_v33 = vadd.f32 1.0, %v2362_v30  ;;  %v3003_v37 = vpop.eup %2363  ;;  %v1511_v59 = vmul.f32 -0.5, %v2362_v30  ;;  %v1514_v55 = vand.u32 2147483647, %v2362_v30  ;;  %v1453_v39 = vmul.f32 1.442695, %v1412_v31 }
 0x1c8   : > { %v3005_v44 = vpop.eup %2365  ;;  %v1499_v5 = vadd.f32 1.0, %v3003_v37  ;;  %v1502_v20 = vmul.f32 -0.5, %v3003_v37  ;;  %v1505_v23 = vand.u32 2147483647, %v3003_v37 }
 0x1c9   : > { %2377 = vlog2.f32 %v1508_v33  ;;  %v1517_v54 = vadd.f32 1.0, %v3005_v44  ;;  %v1512_v45 = vadd.f32 1.0, %v1511_v59  ;;  %vm1515_vm5 = vcmp.lt.f32.partialorder %v1514_v55, 0.0004427343 }
 0x1ca   : > { %v3010_v52 = vpop.eup %2367  ;;  %v1520_v28 = vmul.f32 -0.5, %v3005_v44  ;;  %v1469_v59 = vmul.f32 1.442695, %v1420_v24  ;;  %v1503_v62 = vadd.f32 1.0, %v1502_v20  ;;  %vm3065_vm8 = vcmp.lt.f32.partialorder %v1505_v23, 0.0004427343 }
 0x1cb   : > { %v1526_v53 = vadd.f32 1.0, %v3010_v52  ;;  %v1529_v35 = vmul.f32 -0.5, %v3010_v52  ;;  %v1513_v15 = vmul.f32 %v2362_v30, %v1512_v45  ;;  %v1532_v26 = vand.u32 2147483647, %v3010_v52 }
 0x1cc   : > { %v1467_v30 = vmul.f32 1.442695, %v1419_v58  ;;  %v1523_v31 = vand.u32 2147483647, %v3005_v44  ;;  %v1521_v55 = vadd.f32 1.0, %v1520_v28 }
 0x1cd   : > { %2379 = vlog2.f32 %v1526_v53  ;;  %v1530_v16 = vadd.f32 1.0, %v1529_v35  ;;  %v1220_v53 = vpop.f32.mrf.mxu0  ;;  %vm1533_vm9 = vcmp.lt.f32.partialorder %v1532_v26, 0.0004427343 }
 0x1ce   : > { %v3022_v11 = vpop.eup %2369  ;;  %2381 = vlog2.f32 %v1499_v5  ;;  %v3071_v45 = vadd.f32 %v1220_v53, %v2967_v29  ;;  %v1522_v20 = vmul.f32 %v3005_v44, %v1521_v55  ;;  %vm3099_vm13 = vcmp.lt.f32.partialorder %v1523_v31, 0.0004427343 }
 0x1cf   : > { %v1544_v60 = vadd.f32 1.0, %v3022_v11  ;;  %v3028_v56 = vpop.eup %2371  ;;  %2383 = vlog2.f32 %v1517_v54  ;;  %v1547_v18 = vmul.f32 -0.5, %v3022_v11  ;;  %v1531_v34 = vmul.f32 %v3010_v52, %v1530_v16 }
 0x1d0   : > { %v3032_v36 = vpop.eup %2373  ;;  %v1535_v8 = vadd.f32 1.0, %v3028_v56  ;;  %v1550_v5 = vand.u32 2147483647, %v3022_v11  ;;  %v1381_v16 = vand.u32 2147483647, %v3071_v45  ;;  %v1538_v23 = vmul.f32 -0.5, %v3028_v56 }
 0x1d1   : > { %2385 = vlog2.f32 %v1544_v60  ;;  %v1553_v48 = vadd.f32 1.0, %v3032_v36  ;;  %v1548_v22 = vadd.f32 1.0, %v1547_v18  ;;  %v1556_v24 = vmul.f32 -0.5, %v3032_v36 }
 0x1d2   : > { %v3036_v4 = vpop.eup %2375  ;;  %vm3073_vm10 = vcmp.lt.f32.partialorder %v1550_v5, 0.0004427343  ;;  %v1541_v5 = vand.u32 2147483647, %v3028_v56  ;;  %v1283_v55 = vmax.f32 %v3016_v51, 0.0 }
 0x1d3   : > { %v1562_v19 = vadd.f32 1.0, %v3036_v4  ;;  %v1565_v57 = vmul.f32 -0.5, %v3036_v4  ;;  %v1549_v12 = vmul.f32 %v3022_v11, %v1548_v22  ;;  %v1504_v11 = vmul.f32 %v3003_v37, %v1503_v62 }
 0x1d4   : > { %v1539_v22 = vadd.f32 1.0, %v1538_v23  ;;  %v1279_v62 = vmax.f32 %v2988_v9, 0.0  ;;  %vm3129_vm0 = vcmp.lt.f32.partialorder %v1541_v5, 0.0004427343 }
 0x1d5   : > { %2387 = vlog2.f32 %v1562_v19 }
 0x1d6   : > { %v2378_v13 = vpop.eup %2377  ;;  %2389 = vlog2.f32 %v1535_v8 }
 0x1d7   : > { %v1510_v43 = vmul.f32 0.6931472, %v2378_v13  ;;  %2391 = vlog2.f32 %v1553_v48  ;;  %v1566_v13 = vadd.f32 1.0, %v1565_v57  ;;  %v1557_v57 = vadd.f32 1.0, %v1556_v24 }
 0x1d8   : > { %2393 = vpow2.f32 %v1453_v39 }
 0x1d9   : > { %v1516_v40 = vsel %vm1515_vm5, %v1513_v15, %v1510_v43  ;;  %2395 = vpow2.f32 %v1451_v27  ;;  %v1568_v43 = vand.u32 2147483647, %v3036_v4  ;;  %v1567_v26 = vmul.f32 %v3036_v4, %v1566_v13  ;;  %v1240_v27 = vpop.f32.mrf.mxu1 }
 0x1da   : > { %v1788_v25 = vadd.f32 %v1516_v40, %v1276_v63  ;;  %v2380_v33 = vpop.eup %2379  ;;  %2397 = vpow2.f32 %v1467_v30  ;;  %vm1316_vm5 = vcmp.ne.f32.partialorder %v3008_v41, %v3008_v41 }
 0x1db   : > { %v1528_v32 = vmul.f32 0.6931472, %v2380_v33  ;;  %v2382_v60 = vpop.eup %2381  ;;  %2399 = vpow2.f32 %v1469_v59  ;;  %vm1569_vm14 = vcmp.lt.f32.partialorder %v1568_v43, 0.0004427343  ;;  %v1413_v33 = vsub.f32 0.0, %v1381_v16  ;;  %v1242_v21 = vpop.f32.mrf.mxu1 }
 0x1dc   : > { %v1820_v54 = vsel %vm1308_vm4, %v2976_v46, %v1788_v25  ;;  %v2384_v63 = vpop.eup %2383  ;;  %v1501_v48 = vmul.f32 0.6931472, %v2382_v60  ;;  %v1559_v59 = vand.u32 2147483647, %v3032_v36 }
 0x1dd   : > { %v1852_v50 = vadd.f32 1e-06, %v1820_v54  ;;  %v1534_v46 = vsel %vm1533_vm9, %v1531_v34, %v1528_v32  ;;  %v1519_v58 = vmul.f32 0.6931472, %v2384_v63  ;;  %v3113_v54 = vadd.f32 %v1240_v27, %v2967_v29 }
 0x1de   : > { %v2386_v35 = vpop.eup %2385  ;;  %v1790_v19 = vadd.f32 %v1534_v46, %v1278_v7  ;;  %v1507_v37 = vsel %vm3065_vm8, %v1504_v11, %v1501_v48  ;;  %v1455_v31 = vmul.f32 1.442695, %v1413_v33  ;;  %v1222_v46 = vpop.f32.mrf.mxu0  ;;  %vm3142_vm1 = vcmp.lt.f32.partialorder %v1559_v59, 0.0004427343 }
 0x1df   : > { %v1546_v8 = vmul.f32 0.6931472, %v2386_v35  ;;  %2401 = vrcp.f32 %v1852_v50  ;;  %v1525_v28 = vsel %vm3099_vm13, %v1522_v20, %v1519_v58  ;;  %v1540_v35 = vmul.f32 %v3028_v56, %v1539_v22 }
 0x1e0   : > { %v1822_v39 = vsel %vm1310_vm6, %v2983_v47, %v1790_v19  ;;  %v1789_v60 = vadd.f32 %v1525_v28, %v1277_v6  ;;  %v1389_v19 = vand.u32 2147483647, %v3113_v54  ;;  %vm1315_vm13 = vcmp.ne.f32.partialorder %v3016_v51, %v3016_v51 }
 0x1e1   : > { %v1854_v7 = vadd.f32 1e-06, %v1822_v39  ;;  %v1552_v15 = vsel %vm3073_vm10, %v1549_v12, %v1546_v8  ;;  %v1558_v12 = vmul.f32 %v3032_v36, %v1557_v57 }
 0x1e2   : > { %v2388_v18 = vpop.eup %2387  ;;  %v1792_v47 = vadd.f32 %v1552_v15, %v1280_v10  ;;  %v1821_v48 = vsel %vm1309_vm12, %v2980_v38, %v1789_v60  ;;  %v1421_v39 = vsub.f32 0.0, %v1389_v19  ;;  %v1281_v38 = vmax.f32 %v2996_v14, 0.0 }
 0x1e3   : > { %2403 = vrcp.f32 %v1854_v7  ;;  %v1564_v40 = vmul.f32 0.6931472, %v2388_v18  ;;  %v2390_v25 = vpop.eup %2389  ;;  %v3162_v7 = vadd.f32 %v1242_v21, %v2969_v61  ;;  %v1853_v11 = vadd.f32 1e-06, %v1821_v48 }
 0x1e4   : > { %v1824_v10 = vsel %vm1312_vm7, %v2991_v0, %v1792_v47  ;;  %v2392_v34 = vpop.eup %2391  ;;  %v1787_v0 = vadd.f32 %v1507_v37, %v1275_v2  ;;  %v1226_v37 = vpop.f32.mrf.mxu0  ;;  %vm1324_vm7 = vcmp.ne.f32.partialorder %v3026_v42, %v3026_v42 }
 0x1e5   : > { %v1856_v30 = vadd.f32 1e-06, %v1824_v10  ;;  %v1570_v4 = vsel %vm1569_vm14, %v1567_v26, %v1564_v40  ;;  %v3115_v32 = vpop.eup %2393  ;;  %v1555_v50 = vmul.f32 0.6931472, %v2392_v34  ;;  %v1471_v26 = vmul.f32 1.442695, %v1421_v39 }
 0x1e6   : > { %v1794_v53 = vadd.f32 %v1570_v4, %v1282_v3  ;;  %v1537_v3 = vmul.f32 0.6931472, %v2390_v25  ;;  %v3126_v63 = vpop.eup %2395  ;;  %v1580_v6 = vadd.f32 1.0, %v3115_v32  ;;  %v1819_v8 = vsel %vm1307_vm11, %v2972_v1, %v1787_v0 }
 0x1e7   : > { %2405 = vrcp.f32 %v1856_v30  ;;  %v1571_v58 = vadd.f32 1.0, %v3126_v63  ;;  %v3155_v1 = vadd.f32 %v1222_v46, %v2969_v61  ;;  %v1561_v43 = vsel %vm3142_vm1, %v1558_v12, %v1555_v50  ;;  %v1246_v30 = vpop.f32.mrf.mxu1 }
 0x1e8   : > { %v1826_v52 = vsel %vm1314_vm15, %v2999_v17, %v1794_v53  ;;  %v3135_v17 = vpop.eup %2397  ;;  %v1543_v36 = vsel %vm3129_vm0, %v1540_v35, %v1537_v3  ;;  %v1851_v16 = vadd.f32 1e-06, %v1819_v8  ;;  %v1793_v40 = vadd.f32 %v1561_v43, %v1281_v38  ;;  %v1228_v53 = vpop.f32.mrf.mxu0 }
 0x1e9   : > { %v1858_v2 = vadd.f32 1e-06, %v1826_v52  ;;  %v3146_v13 = vpop.eup %2399  ;;  %v1643_v18 = vadd.f32 1.0, %v3135_v17  ;;  %v1382_v23 = vand.u32 2147483647, %v3155_v1  ;;  %v1791_v24 = vadd.f32 %v1543_v36, %v1279_v62  ;;  %v1248_v57 = vpop.f32.mrf.mxu1 }
 0x1ea   : > { %v1652_v20 = vadd.f32 1.0, %v3146_v13  ;;  %v1390_v27 = vand.u32 2147483647, %v3162_v7  ;;  %v1825_v22 = vsel %vm1313_vm3, %v2996_v14, %v1793_v40  ;;  %v3181_v62 = vadd.f32 %v1228_v53, %v2969_v61  ;;  %v1230_v40 = vpop.f32.mrf.mxu0 }
 0x1eb   : > { %2407 = vrcp.f32 %v1858_v2  ;;  %v1414_v25 = vsub.f32 0.0, %v1382_v23  ;;  %v1823_v34 = vsel %vm1311_vm2, %v2988_v9, %v1791_v24  ;;  %v1857_v60 = vadd.f32 1e-06, %v1825_v22 }
 0x1ec   : > { %2409 = vpow2.f32 %v1455_v31  ;;  %v2402_v15 = vpop.eup %2401  ;;  %v1422_v28 = vsub.f32 0.0, %v1390_v27  ;;  %v1855_v59 = vadd.f32 1e-06, %v1823_v34  ;;  %v1583_v9 = vmul.f32 -0.5, %v3115_v32 }
 0x1ed   : > { %2411 = vlog2.f32 %v1580_v6  ;;  %v1899_v44 = vmul.f32 %v2402_v15, %v1851_v16  ;;  %v1457_v33 = vmul.f32 1.442695, %v1414_v25  ;;  %v3185_v50 = vadd.f32 %v1248_v57, %v2969_v61 }
 0x1ee   : > { %2413 = vlog2.f32 %v1571_v58  ;;  %v1473_v5 = vmul.f32 1.442695, %v1422_v28  ;;  %v3190_v31 = vadd.f32 %v1226_v37, %v2967_v29  ;;  %v1574_v6 = vmul.f32 -0.5, %v3126_v63 }
 0x1ef   : > { %2415 = vlog2.f32 %v1643_v18  ;;  %v1384_v19 = vand.u32 2147483647, %v3181_v62  ;;  %v1577_v21 = vand.u32 2147483647, %v3126_v63  ;;  %v1291_v8 = vmax.f32 %v3019_v49, 0.0 }
 0x1f0   : > { %v2404_v47 = vpop.eup %2403  ;;  %2417 = vlog2.f32 %v1652_v20  ;;  %v1584_v12 = vadd.f32 1.0, %v1583_v9  ;;  %v1586_v56 = vand.u32 2147483647, %v3115_v32  ;;  %v1655_v48 = vmul.f32 -0.5, %v3146_v13 }
 0x1f1   : > { %v1900_v10 = vmul.f32 %v2404_v47, %v1853_v11  ;;  %2419 = vpow2.f32 %v1471_v26  ;;  %v1416_v39 = vsub.f32 0.0, %v1384_v19  ;;  %v1392_v36 = vand.u32 2147483647, %v3185_v50 }
 0x1f2   : > { %2421 = vpow2.f32 %v1457_v33  ;;  %v1284_v15 = vmax.f32 %v3008_v41, 0.0  ;;  %v1292_v38 = vmax.f32 %v3026_v42, 0.0  ;;  %v1383_v18 = vand.u32 2147483647, %v3190_v31 }
 0x1f3   : > { %v2197_v4 = vpack.c.bf16 %v1900_v10, %v1899_v44  ;;  %2423 = vpow2.f32 %v1473_v5  ;;  %v1575_v20 = vadd.f32 1.0, %v1574_v6  ;;  %v3206_v23 = vadd.f32 %v1246_v30, %v2967_v29 }
 0x1f4   : > { %v2406_v0 = vpop.eup %2405  ;;  %v1461_v47 = vmul.f32 1.442695, %v1416_v39  ;;  %v1424_v24 = vsub.f32 0.0, %v1392_v36  ;;  %vm3208_vm4 = vcmp.lt.f32.partialorder %v1577_v21, 0.0004427343  ;;  %v1646_v37 = vmul.f32 -0.5, %v3135_v17 }
 0x1f5   : > { %2198 = vst [vmem:[%s3177_s14] sm:$0xff] %v2197_v4   ;;  %v1901_v14 = vmul.f32 %v2406_v0, %v1855_v59  ;;  %v1585_v44 = vmul.f32 %v3115_v32, %v1584_v12  ;;  %vm3216_vm6 = vcmp.lt.f32.partialorder %v1586_v56, 0.0004427343  ;;  %v1656_v28 = vadd.f32 1.0, %v1655_v48  ;;  %v1232_v12 = vpop.f32.mrf.mxu0 }
 0x1f6   : > { %v1658_v30 = vand.u32 2147483647, %v3146_v13  ;;  %v1477_v4 = vmul.f32 1.442695, %v1424_v24  ;;  %v1415_v22 = vsub.f32 0.0, %v1383_v18  ;;  %v3228_v32 = vadd.f32 %v1230_v40, %v2967_v29 }
 0x1f7   : > { %v1391_v57 = vand.u32 2147483647, %v3206_v23  ;;  %v1576_v6 = vmul.f32 %v3126_v63, %v1575_v20  ;;  %v3264_v18 = vadd.f32 %v1232_v12, %v2969_v61  ;;  %vm1318_vm11 = vcmp.ne.f32.partialorder %v3155_v1, %v3155_v1 }
 0x1f8   : > { %v2408_v3 = vpop.eup %2407  ;;  %vm3241_vm8 = vcmp.lt.f32.partialorder %v1658_v30, 0.0004427343  ;;  %v1459_v48 = vmul.f32 1.442695, %v1415_v22  ;;  %v1286_v22 = vmax.f32 %v3155_v1, 0.0  ;;  %vm1326_vm12 = vcmp.ne.f32.partialorder %v3162_v7, %v3162_v7 }
 0x1f9   : > { %v1902_v52 = vmul.f32 %v2408_v3, %v1857_v60  ;;  %v3187_v2 = vpop.eup %2409  ;;  %v1647_v60 = vadd.f32 1.0, %v1646_v37  ;;  %v1649_v3 = vand.u32 2147483647, %v3135_v17  ;;  %vm1323_vm14 = vcmp.ne.f32.partialorder %v3019_v49, %v3019_v49 }
 0x1fa   : > { %v2412_v46 = vpop.eup %2411  ;;  %v1589_v58 = vadd.f32 1.0, %v3187_v2  ;;  %v1595_v40 = vand.u32 2147483647, %v3187_v2  ;;  %vm1317_vm1 = vcmp.ne.f32.partialorder %v3071_v45, %v3071_v45  ;;  %vm1325_vm2 = vcmp.ne.f32.partialorder %v3113_v54, %v3113_v54 }
 0x1fb   : > { %v2202_v35 = vpack.c.bf16 %v1902_v52, %v1901_v14  ;;  %v2414_v43 = vpop.eup %2413  ;;  %v1582_v16 = vmul.f32 0.6931472, %v2412_v46  ;;  %v1657_v52 = vmul.f32 %v3146_v13, %v1656_v28  ;;  %v1385_v13 = vand.u32 2147483647, %v3228_v32 }
 0x1fc   : > { %v2416_v11 = vpop.eup %2415  ;;  %2425 = vlog2.f32 %v1589_v58  ;;  %v1573_v59 = vmul.f32 0.6931472, %v2414_v43  ;;  %v1423_v58 = vsub.f32 0.0, %v1391_v57  ;;  %v1648_v36 = vmul.f32 %v3135_v17, %v1647_v60 }
 0x1fd   : > { %2234 = vst [vmem:[%s3177_s14 + $0x8] sm:$0xff] %v2202_v35   ;;  %v2418_v26 = vpop.eup %2417  ;;  %v1588_v34 = vsel %vm3216_vm6, %v1585_v44, %v1582_v16  ;;  %2427 = vpow2.f32 %v1461_v47  ;;  %v1250_v35 = vpop.f32.mrf.mxu1  ;;  %v1645_v19 = vmul.f32 0.6931472, %v2416_v11  ;;  %vm3251_vm9 = vcmp.lt.f32.partialorder %v1649_v3, 0.0004427343 }
 0x1fe   : > { %v3220_v25 = vpop.eup %2419  ;;  %v1654_v53 = vmul.f32 0.6931472, %v2418_v26  ;;  %2429 = vpow2.f32 %v1477_v4  ;;  %v1796_v14 = vadd.f32 %v1588_v34, %v1284_v15  ;;  %v1579_v39 = vsel %vm3208_vm4, %v1576_v6, %v1573_v59 }
 0x1ff   : > { %v3223_v33 = vpop.eup %2421  ;;  %v1661_v46 = vadd.f32 1.0, %v3220_v25  ;;  %v1592_v43 = vmul.f32 -0.5, %v3187_v2  ;;  %v3261_v16 = vadd.f32 %v1250_v35, %v2967_v29  ;;  %v1252_v11 = vpop.f32.mrf.mxu1  ;;  %v1651_v17 = vsel %vm3251_vm9, %v1648_v36, %v1645_v19 }
 0x200   : > { %v3230_v5 = vpop.eup %2423  ;;  %v1598_v0 = vadd.f32 1.0, %v3223_v33  ;;  %v1660_v56 = vsel %vm3241_vm8, %v1657_v52, %v1654_v53  ;;  %v1828_v15 = vsel %vm1316_vm5, %v3008_v41, %v1796_v14  ;;  %v1285_v47 = vmax.f32 %v3071_v45, 0.0 }
 0x201   : > { %v1670_v9 = vadd.f32 1.0, %v3230_v5  ;;  %v1804_v20 = vadd.f32 %v1660_v56, %v1292_v38  ;;  %v1601_v24 = vmul.f32 -0.5, %v3223_v33  ;;  %v1475_v41 = vmul.f32 1.442695, %v1423_v58  ;;  %v1256_v58 = vpop.f32.mrf.mxu1 }
 0x202   : > { %2431 = vlog2.f32 %v1598_v0  ;;  %v1417_v26 = vsub.f32 0.0, %v1385_v13  ;;  %v3273_v27 = vadd.f32 %v1579_v39, %v1283_v55  ;;  %v1860_v37 = vadd.f32 1e-06, %v1828_v15 }
 0x203   : > { %2433 = vlog2.f32 %v1670_v9  ;;  %v1673_v44 = vmul.f32 -0.5, %v3230_v5  ;;  %v3277_v10 = vadd.f32 %v1252_v11, %v2969_v61  ;;  %v3281_v38 = vadd.f32 %v1651_v17, %v1291_v8 }
 0x204   : > { %2435 = vlog2.f32 %v1661_v46  ;;  %v1593_v28 = vadd.f32 1.0, %v1592_v43  ;;  %v1393_v30 = vand.u32 2147483647, %v3261_v16  ;;  %v1386_v4 = vand.u32 2147483647, %v3264_v18 }
 0x205   : > { %2437 = vpow2.f32 %v1459_v48  ;;  %v1836_v55 = vsel %vm1324_vm7, %v3026_v42, %v1804_v20  ;;  %v1602_v53 = vadd.f32 1.0, %v1601_v24  ;;  %v1604_v0 = vand.u32 2147483647, %v3223_v33 }
 0x206   : > { %vm3293_vm10 = vcmp.lt.f32.partialorder %v1595_v40, 0.0004427343  ;;  %v1294_v59 = vmax.f32 %v3162_v7, 0.0  ;;  %2439 = vpow2.f32 %v1475_v41  ;;  %v1463_v60 = vmul.f32 1.442695, %v1417_v26  ;;  %v1258_v26 = vpop.f32.mrf.mxu1 }
 0x207   : > { %2441 = vrcp.f32 %v1860_v37  ;;  %v1674_v42 = vadd.f32 1.0, %v1673_v44  ;;  %v1418_v9 = vsub.f32 0.0, %v1386_v4  ;;  %v1394_v14 = vand.u32 2147483647, %v3277_v10 }
 0x208   : > { %v1868_v52 = vadd.f32 1e-06, %v1836_v55  ;;  %v1594_v46 = vmul.f32 %v3187_v2, %v1593_v28  ;;  %v1676_v35 = vand.u32 2147483647, %v3230_v5  ;;  %v1425_v6 = vsub.f32 0.0, %v1393_v30 }
 0x209   : > { %v2426_v34 = vpop.eup %2425  ;;  %v1664_v21 = vmul.f32 -0.5, %v3220_v25  ;;  %v1603_v12 = vmul.f32 %v3223_v33, %v1602_v53  ;;  %vm3313_vm15 = vcmp.lt.f32.partialorder %v1604_v0, 0.0004427343  ;;  %2443 = vpow2.f32 %v1463_v60 }
 0x20a   : > { %v3291_v57 = vpop.eup %2427  ;;  %v1591_v2 = vmul.f32 0.6931472, %v2426_v34  ;;  %v1675_v43 = vmul.f32 %v3230_v5, %v1674_v42  ;;  %v1465_v15 = vmul.f32 1.442695, %v1418_v9  ;;  %v1426_v11 = vsub.f32 0.0, %v1394_v14 }
 0x20b   : > { %v3300_v3 = vpop.eup %2429  ;;  %v1616_v48 = vadd.f32 1.0, %v3291_v57  ;;  %2445 = vrcp.f32 %v1868_v52  ;;  %vm1677_vm0 = vcmp.lt.f32.partialorder %v1676_v35, 0.0004427343  ;;  %v1479_v17 = vmul.f32 1.442695, %v1425_v6 }
 0x20c   : > { %v1688_v36 = vadd.f32 1.0, %v3300_v3  ;;  %v1667_v24 = vand.u32 2147483647, %v3220_v25  ;;  %v1665_v37 = vadd.f32 1.0, %v1664_v21  ;;  %v3326_v44 = vadd.f32 %v1256_v58, %v2967_v29 }
 0x20d   : > { %2447 = vlog2.f32 %v1616_v48  ;;  %v1597_v30 = vsel %vm3293_vm10, %v1594_v46, %v1591_v2  ;;  %v1481_v34 = vmul.f32 1.442695, %v1426_v11  ;;  %v1827_v0 = vsel %vm1315_vm13, %v3016_v51, %v3273_v27 }
 0x20e   : > { %2449 = vlog2.f32 %v1688_v36  ;;  %v1293_v8 = vmax.f32 %v3113_v54, 0.0  ;;  %v1835_v60 = vsel %vm1323_vm14, %v3019_v49, %v3281_v38  ;;  %v1797_v51 = vadd.f32 %v1597_v30, %v1285_v47 }
 0x20f   : > { %v2432_v19 = vpop.eup %2431  ;;  %2451 = vpow2.f32 %v1465_v15  ;;  %vm3359_vm3 = vcmp.lt.f32.partialorder %v1667_v24, 0.0004427343  ;;  %v1859_v49 = vadd.f32 1e-06, %v1827_v0  ;;  %v1395_v38 = vand.u32 2147483647, %v3326_v44 }
 0x210   : > { %v2434_v13 = vpop.eup %2433  ;;  %v1600_v39 = vmul.f32 0.6931472, %v2432_v19  ;;  %2453 = vpow2.f32 %v1479_v17  ;;  %v3367_v52 = vadd.f32 %v1258_v26, %v2969_v61  ;;  %v1867_v46 = vadd.f32 1e-06, %v1835_v60 }
 0x211   : > { %v1672_v63 = vmul.f32 0.6931472, %v2434_v13  ;;  %v2436_v20 = vpop.eup %2435  ;;  %2455 = vpow2.f32 %v1481_v34  ;;  %v1287_v47 = vmax.f32 %v3190_v31, 0.0  ;;  %v1295_v6 = vmax.f32 %v3206_v23, 0.0 }
 0x212   : > { %v1606_v33 = vsel %vm3313_vm15, %v1603_v12, %v1600_v39  ;;  %v3328_v28 = vpop.eup %2437  ;;  %v1663_v55 = vmul.f32 0.6931472, %v2436_v20  ;;  %v1288_v12 = vmax.f32 %v3181_v62, 0.0  ;;  %v1619_v56 = vmul.f32 -0.5, %v3291_v57 }
 0x213   : > { %v1798_v40 = vadd.f32 %v1606_v33, %v1286_v22  ;;  %v1678_v41 = vsel %vm1677_vm0, %v1675_v43, %v1672_v63  ;;  %v1607_v42 = vadd.f32 1.0, %v3328_v28  ;;  %v3353_v9 = vpop.eup %2439  ;;  %v1610_v35 = vmul.f32 -0.5, %v3328_v28 }
 0x214   : > { %v1806_v5 = vadd.f32 %v1678_v41, %v1294_v59  ;;  %v2442_v14 = vpop.eup %2441  ;;  %v1679_v21 = vadd.f32 1.0, %v3353_v9  ;;  %v1829_v58 = vsel %vm1317_vm1, %v3071_v45, %v1797_v51  ;;  %v1691_v2 = vmul.f32 -0.5, %v3300_v3 }
 0x215   : > { %v1830_v4 = vsel %vm1318_vm11, %v3155_v1, %v1798_v40  ;;  %v1260_v1 = vpop.f32.mrf.mxu1  ;;  %v1622_v36 = vand.u32 2147483647, %v3291_v57  ;;  %v1427_v63 = vsub.f32 0.0, %v1395_v38  ;;  %v1396_v43 = vand.u32 2147483647, %v3367_v52 }
 0x216   : > { %v1862_v22 = vadd.f32 1e-06, %v1830_v4  ;;  %v1838_v53 = vsel %vm1326_vm12, %v3162_v7, %v1806_v5  ;;  %v1666_v7 = vmul.f32 %v3220_v25, %v1665_v37  ;;  %v3375_v48 = vpop.eup %2443  ;;  %v3383_v39 = vadd.f32 %v1260_v1, %v2967_v29 }
 0x217   : > { %v1870_v59 = vadd.f32 1e-06, %v1838_v53  ;;  %v1262_v19 = vpop.f32.mrf.mxu1  ;;  %v3390_v33 = vadd.f32 1.0, %v1610_v35  ;;  %v1613_v17 = vand.u32 2147483647, %v3328_v28  ;;  %v1682_v45 = vmul.f32 -0.5, %v3353_v9 }
 0x218   : > { %2457 = vrcp.f32 %v1862_v22  ;;  %v1669_v25 = vsel %vm3359_vm3, %v1666_v7, %v1663_v55  ;;  %v3388_v15 = vadd.f32 %v1262_v19, %v2969_v61  ;;  %v2446_v11 = vpop.eup %2445  ;;  %v1296_v20 = vmax.f32 %v3185_v50, 0.0 }
 0x219   : > { %2459 = vrcp.f32 %v1870_v59  ;;  %v1805_v13 = vadd.f32 %v1669_v25, %v1293_v8  ;;  %v1861_v40 = vadd.f32 1e-06, %v1829_v58  ;;  %v1620_v41 = vadd.f32 1.0, %v1619_v56  ;;  %v1266_v59 = vpop.f32.mrf.mxu1 }
 0x21a   : > { %2461 = vlog2.f32 %v1607_v42  ;;  %v2448_v24 = vpop.eup %2447  ;;  %v1625_v26 = vadd.f32 1.0, %v3375_v48  ;;  %v1692_v30 = vadd.f32 1.0, %v1691_v2  ;;  %v1428_v4 = vsub.f32 0.0, %v1396_v43 }
 0x21b   : > { %2463 = vlog2.f32 %v1679_v21  ;;  %v2450_v37 = vpop.eup %2449  ;;  %v1837_v5 = vsel %vm1325_vm2, %v3113_v54, %v1805_v13  ;;  %v1397_v34 = vand.u32 2147483647, %v3383_v39  ;;  %v1903_v22 = vmul.f32 %v2442_v14, %v1859_v49  ;;  %v1268_v58 = vpop.f32.mrf.mxu1 }
 0x21c   : > { %v3401_v55 = vpop.eup %2451  ;;  %vm3403_vm4 = vcmp.lt.f32.partialorder %v1622_v36, 0.0004427343  ;;  %v1483_v0 = vmul.f32 1.442695, %v1427_v63  ;;  %v1398_v8 = vand.u32 2147483647, %v3388_v15  ;;  %v1907_v60 = vmul.f32 %v2446_v11, %v1867_v46 }
 0x21d   : > { %v3408_v1 = vpop.eup %2453  ;;  %v1618_v7 = vmul.f32 0.6931472, %v2448_v24  ;;  %v1694_v54 = vand.u32 2147483647, %v3300_v3  ;;  %v1634_v42 = vadd.f32 1.0, %v3401_v55  ;;  %v1621_v14 = vmul.f32 %v3291_v57, %v1620_v41 }
 0x21e   : > { %v3412_v51 = vpop.eup %2455  ;;  %v1869_v27 = vadd.f32 1e-06, %v1837_v5  ;;  %v1690_v49 = vmul.f32 0.6931472, %v2450_v37  ;;  %2465 = vlog2.f32 %v1625_v26  ;;  %vm1320_vm5 = vcmp.ne.f32.partialorder %v3181_v62, %v3181_v62 }
 0x21f   : > { %v1693_v38 = vmul.f32 %v3300_v3, %v1692_v30  ;;  %2467 = vlog2.f32 %v1634_v42  ;;  %v1485_v46 = vmul.f32 1.442695, %v1428_v4  ;;  %v1429_v35 = vsub.f32 0.0, %v1397_v34  ;;  %v1270_v4 = vpop.f32.mrf.mxu1 }
 0x220   : > { %vm1328_vm6 = vcmp.ne.f32.partialorder %v3185_v50, %v3185_v50  ;;  %v1706_v56 = vadd.f32 1.0, %v3412_v51  ;;  %2469 = vpow2.f32 %v1483_v0  ;;  %v1430_v57 = vsub.f32 0.0, %v1398_v8 }
 0x221   : > { %v1624_v2 = vsel %vm3403_vm4, %v1621_v14, %v1618_v7  ;;  %vm3423_vm7 = vcmp.lt.f32.partialorder %v1694_v54, 0.0004427343  ;;  %v1697_v36 = vadd.f32 1.0, %v3408_v1  ;;  %vm3428_vm8 = vcmp.lt.f32.partialorder %v1613_v17, 0.0004427343  ;;  %v1272_v42 = vpop.f32.mrf.mxu1 }
 0x222   : > { %v1696_v11 = vsel %vm3423_vm7, %v1693_v38, %v1690_v49  ;;  %2471 = vlog2.f32 %v1706_v56  ;;  %v1683_v41 = vadd.f32 1.0, %v1682_v45  ;;  %v1487_v26 = vmul.f32 1.442695, %v1429_v35 }
 0x223   : > { %2473 = vpow2.f32 %v1485_v46  ;;  %v1800_v37 = vadd.f32 %v1624_v2, %v1288_v12  ;;  %v1628_v5 = vmul.f32 -0.5, %v3375_v48  ;;  %v1489_v30 = vmul.f32 1.442695, %v1430_v57 }
 0x224   : > { %v3439_v17 = vadd.f32 %v1268_v58, %v2969_v61  ;;  %v1685_v34 = vand.u32 2147483647, %v3353_v9  ;;  %2475 = vlog2.f32 %v1697_v36  ;;  %v1637_v45 = vmul.f32 -0.5, %v3401_v55 }
 0x225   : > { %v2458_v25 = vpop.eup %2457  ;;  %v3448_v0 = vmul.f32 %v3328_v28, %v3390_v33  ;;  %2477 = vpow2.f32 %v1489_v30  ;;  %v3451_v12 = vadd.f32 %v1266_v59, %v2967_v29  ;;  %v1290_v7 = vmax.f32 %v3264_v18, 0.0 }
 0x226   : > { %v2460_v19 = vpop.eup %2459  ;;  %v1904_v21 = vmul.f32 %v2458_v25, %v1861_v40  ;;  %2479 = vpow2.f32 %v1487_v26  ;;  %v1832_v54 = vsel %vm1320_vm5, %v3181_v62, %v1800_v37  ;;  %v1629_v28 = vadd.f32 1.0, %v1628_v5 }
 0x227   : > { %v1908_v13 = vmul.f32 %v2460_v19, %v1869_v27  ;;  %v2462_v24 = vpop.eup %2461  ;;  %v1631_v33 = vand.u32 2147483647, %v3375_v48  ;;  %v1709_v59 = vmul.f32 -0.5, %v3412_v51  ;;  %vm1322_vm9 = vcmp.ne.f32.partialorder %v3264_v18, %v3264_v18 }
 0x228   : > { %v2207_v63 = vpack.c.bf16 %v1904_v21, %v1903_v22  ;;  %v1808_v22 = vadd.f32 %v1696_v11, %v1296_v20  ;;  %v3444_v53 = vmul.f32 0.6931472, %v2462_v24  ;;  %v2464_v8 = vpop.eup %2463  ;;  %v1400_v20 = vand.u32 2147483647, %v3439_v17 }
 0x229   : > { %v2217_v40 = vpack.c.bf16 %v1908_v13, %v1907_v60  ;;  %v3454_v60 = vmul.f32 %v3353_v9, %v1683_v41  ;;  %v1638_v27 = vadd.f32 1.0, %v1637_v45  ;;  %v1640_v14 = vand.u32 2147483647, %v3401_v55 }
 0x22a   : > { %2235 = vst [vmem:[%s3177_s14 + $0x10] sm:$0xff] %v2207_v63   ;;  %v1840_v9 = vsel %vm1328_vm6, %v3185_v50, %v1808_v22  ;;  %v1432_v49 = vsub.f32 0.0, %v1400_v20  ;;  %v1615_v62 = vsel %vm3428_vm8, %v3448_v0, %v3444_v53  ;;  %vm3475_vm10 = vcmp.lt.f32.partialorder %v1685_v34, 0.0004427343 }
 0x22b   : > { %2237 = vst [vmem:[%s3177_s14 + $0x20] sm:$0xff] %v2217_v40   ;;  %v1298_v38 = vmax.f32 %v3277_v10, 0.0  ;;  %v1399_v50 = vand.u32 2147483647, %v3451_v12  ;;  %v3482_v46 = vadd.f32 %v1270_v4, %v2967_v29  ;;  %v2466_v35 = vpop.eup %2465  ;;  %v1681_v19 = vmul.f32 0.6931472, %v2464_v8 }
 0x22c   : > { %v1864_v21 = vadd.f32 1e-06, %v1832_v54  ;;  %v1493_v56 = vmul.f32 1.442695, %v1432_v49  ;;  %v3485_v57 = vadd.f32 %v1272_v42, %v2969_v61  ;;  %v2468_v58 = vpop.eup %2467  ;;  %v1872_v13 = vadd.f32 1e-06, %v1840_v9 }
 0x22d   : > { %v1630_v2 = vmul.f32 %v3375_v48, %v1629_v28  ;;  %vm3488_vm11 = vcmp.lt.f32.partialorder %v1631_v33, 0.0004427343  ;;  %vm1330_vm12 = vcmp.ne.f32.partialorder %v3277_v10, %v3277_v10  ;;  %v1710_v29 = vadd.f32 1.0, %v1709_v59  ;;  %v3494_v36 = vpop.eup %2469 }
 0x22e   : > { %v1636_v63 = vmul.f32 0.6931472, %v2468_v58  ;;  %v1639_v11 = vmul.f32 %v3401_v55, %v1638_v27  ;;  %vm1641_vm13 = vcmp.lt.f32.partialorder %v1640_v14, 0.0004427343  ;;  %v1712_v61 = vand.u32 2147483647, %v3412_v51 }
 0x22f   : > { %v1431_v24 = vsub.f32 0.0, %v1399_v50  ;;  %2481 = vpow2.f32 %v1493_v56  ;;  %v1401_v48 = vand.u32 2147483647, %v3482_v46  ;;  %v1402_v40 = vand.u32 2147483647, %v3485_v57  ;;  %v2472_v41 = vpop.eup %2471 }
 0x230   : > { %2483 = vrcp.f32 %v1864_v21  ;;  %v1627_v26 = vmul.f32 0.6931472, %v2466_v35  ;;  %v1700_v37 = vmul.f32 -0.5, %v3408_v1  ;;  %v1642_v5 = vsel %vm1641_vm13, %v1639_v11, %v1636_v63  ;;  %v3501_v30 = vpop.eup %2473 }
 0x231   : > { %v1802_v4 = vadd.f32 %v1642_v5, %v1290_v7  ;;  %v1708_v34 = vmul.f32 0.6931472, %v2472_v41  ;;  %v1711_v55 = vmul.f32 %v3412_v51, %v1710_v29  ;;  %v1715_v22 = vadd.f32 1.0, %v3494_v36  ;;  %v2476_v20 = vpop.eup %2475 }
 0x232   : > { %2485 = vrcp.f32 %v1872_v13  ;;  %vm1713_vm14 = vcmp.lt.f32.partialorder %v1712_v61, 0.0004427343  ;;  %v1724_v45 = vadd.f32 1.0, %v3501_v30  ;;  %v1434_v8 = vsub.f32 0.0, %v1402_v40  ;;  %v3510_v7 = vpop.eup %2477 }
 0x233   : > { %v1834_v54 = vsel %vm1322_vm9, %v3264_v18, %v1802_v4  ;;  %v1714_v28 = vsel %vm1713_vm14, %v1711_v55, %v1708_v34  ;;  %v1491_v33 = vmul.f32 1.442695, %v1431_v24  ;;  %v1433_v59 = vsub.f32 0.0, %v1401_v48  ;;  %v3515_v27 = vpop.eup %2479 }
 0x234   : > { %v1687_v51 = vsel %vm3475_vm10, %v3454_v60, %v1681_v19  ;;  %v1866_v42 = vadd.f32 1e-06, %v1834_v54  ;;  %v1810_v9 = vadd.f32 %v1714_v28, %v1298_v38  ;;  %2487 = vlog2.f32 %v1724_v45 }
 0x235   : > { %v1633_v14 = vsel %vm3488_vm11, %v1630_v2, %v1627_v26  ;;  %v1701_v49 = vadd.f32 1.0, %v1700_v37  ;;  %v1703_v18 = vand.u32 2147483647, %v3408_v1  ;;  %2489 = vlog2.f32 %v1715_v22 }
 0x236   : > { %2491 = vrcp.f32 %v1866_v42  ;;  %v1842_v50 = vsel %vm1330_vm12, %v3277_v10, %v1810_v9  ;;  %v1742_v60 = vadd.f32 1.0, %v3510_v7  ;;  %v1497_v25 = vmul.f32 1.442695, %v1434_v8 }
 0x237   : > { %v1699_v38 = vmul.f32 0.6931472, %v2476_v20  ;;  %v1874_v35 = vadd.f32 1e-06, %v1842_v50  ;;  %2493 = vpow2.f32 %v1491_v33  ;;  %v1495_v19 = vmul.f32 1.442695, %v1433_v59 }
 0x238   : > { %v1289_v21 = vmax.f32 %v3228_v32, 0.0  ;;  %v1733_v56 = vadd.f32 1.0, %v3515_v27  ;;  %2495 = vlog2.f32 %v1742_v60  ;;  %v1799_v10 = vadd.f32 %v1615_v62, %v1287_v47 }
 0x239   : > { %v1807_v58 = vadd.f32 %v1687_v51, %v1295_v6  ;;  %v1702_v13 = vmul.f32 %v3408_v1, %v1701_v49  ;;  %2497 = vrcp.f32 %v1874_v35  ;;  %vm3537_vm15 = vcmp.lt.f32.partialorder %v1703_v18, 0.0004427343 }
 0x23a   : > { %v1801_v2 = vadd.f32 %v1633_v14, %v1289_v21  ;;  %v1727_v29 = vmul.f32 -0.5, %v3501_v30  ;;  %2499 = vpow2.f32 %v1497_v25  ;;  %vm1319_vm0 = vcmp.ne.f32.partialorder %v3190_v31, %v3190_v31 }
 0x23b   : > { %v1705_v43 = vsel %vm3537_vm15, %v1702_v13, %v1699_v38  ;;  %2501 = vpow2.f32 %v1495_v19  ;;  %vm1327_vm1 = vcmp.ne.f32.partialorder %v3206_v23, %v3206_v23  ;;  %v1297_v47 = vmax.f32 %v3261_v16, 0.0 }
 0x23c   : > { %v3544_v53 = vpop.eup %2481  ;;  %2503 = vlog2.f32 %v1733_v56  ;;  %v1831_v1 = vsel %vm1319_vm0, %v3190_v31, %v1799_v10  ;;  %v1839_v0 = vsel %vm1327_vm1, %v3206_v23, %v1807_v58  ;;  %vm1321_vm2 = vcmp.ne.f32.partialorder %v3228_v32, %v3228_v32 }
 0x23d   : > { %v2484_v6 = vpop.eup %2483  ;;  %v1760_v62 = vadd.f32 1.0, %v3544_v53  ;;  %v1833_v63 = vsel %vm1321_vm2, %v3228_v32, %v1801_v2  ;;  %v1809_v11 = vadd.f32 %v1705_v43, %v1297_v47  ;;  %v1728_v61 = vadd.f32 1.0, %v1727_v29 }
 0x23e   : > { %v1745_v24 = vmul.f32 -0.5, %v3510_v7  ;;  %v1730_v40 = vand.u32 2147483647, %v3501_v30  ;;  %v1863_v26 = vadd.f32 1e-06, %v1831_v1  ;;  %vm1329_vm3 = vcmp.ne.f32.partialorder %v3261_v16, %v3261_v16 }
 0x23f   : > { %v2486_v48 = vpop.eup %2485  ;;  %2505 = vlog2.f32 %v1760_v62  ;;  %v1871_v31 = vadd.f32 1e-06, %v1839_v0  ;;  %v1865_v37 = vadd.f32 1e-06, %v1833_v63  ;;  %v1841_v5 = vsel %vm1329_vm3, %v3261_v16, %v1809_v11 }
 0x240   : > { %v1729_v32 = vmul.f32 %v3501_v30, %v1728_v61  ;;  %v1746_v34 = vadd.f32 1.0, %v1745_v24  ;;  %v1300_v22 = vmax.f32 %v3367_v52, 0.0  ;;  %vm1332_vm4 = vcmp.ne.f32.partialorder %v3367_v52, %v3367_v52 }
 0x241   : > { %v2488_v41 = vpop.eup %2487  ;;  %vm1731_vm5 = vcmp.lt.f32.partialorder %v1730_v40, 0.0004427343  ;;  %v1748_v45 = vand.u32 2147483647, %v3510_v7  ;;  %v1905_v20 = vmul.f32 %v2484_v6, %v1863_v26  ;;  %v1302_v16 = vmax.f32 %v3388_v15, 0.0 }
 0x242   : > { %v2490_v23 = vpop.eup %2489  ;;  %v1726_v4 = vmul.f32 0.6931472, %v2488_v41  ;;  %v1909_v30 = vmul.f32 %v2486_v48, %v1871_v31  ;;  %v1873_v59 = vadd.f32 1e-06, %v1841_v5  ;;  %v1718_v51 = vmul.f32 -0.5, %v3494_v36 }
 0x243   : > { %v2492_v55 = vpop.eup %2491  ;;  %v1736_v49 = vmul.f32 -0.5, %v3515_v27  ;;  %v1747_v50 = vmul.f32 %v3510_v7, %v1746_v34  ;;  %vm1749_vm6 = vcmp.lt.f32.partialorder %v1748_v45, 0.0004427343  ;;  %v1763_v35 = vmul.f32 -0.5, %v3544_v53 }
 0x244   : > { %v3567_v8 = vpop.eup %2493  ;;  %v1906_v54 = vmul.f32 %v2492_v55, %v1865_v37  ;;  %v1732_v28 = vsel %vm1731_vm5, %v1729_v32, %v1726_v4  ;;  %vm1334_vm7 = vcmp.ne.f32.partialorder %v3388_v15, %v3388_v15  ;;  %v1721_v13 = vand.u32 2147483647, %v3494_v36 }
 0x245   : > { %v2496_v33 = vpop.eup %2495  ;;  %v1812_v42 = vadd.f32 %v1732_v28, %v1300_v22  ;;  %v1717_v3 = vmul.f32 0.6931472, %v2490_v23  ;;  %v1719_v29 = vadd.f32 1.0, %v1718_v51  ;;  %v1737_v43 = vadd.f32 1.0, %v1736_v49 }
 0x246   : > { %v2498_v9 = vpop.eup %2497  ;;  %v2212_v14 = vpack.c.bf16 %v1906_v54, %v1905_v20  ;;  %v1744_v18 = vmul.f32 0.6931472, %v2496_v33  ;;  %v1739_v47 = vand.u32 2147483647, %v3515_v27  ;;  %v1764_v1 = vadd.f32 1.0, %v1763_v35 }
 0x247   : > { %v3573_v60 = vpop.eup %2499  ;;  %v1910_v25 = vmul.f32 %v2498_v9, %v1873_v59  ;;  %v1844_v38 = vsel %vm1332_vm4, %v3367_v52, %v1812_v42  ;;  %v1751_v52 = vadd.f32 1.0, %v3567_v8  ;;  %v1766_v61 = vand.u32 2147483647, %v3544_v53 }
 0x248   : > { %v3580_v19 = vpop.eup %2501  ;;  %2236 = vst [vmem:[%s3177_s14 + $0x18] sm:$0xff] %v2212_v14   ;;  %v1876_v21 = vadd.f32 1e-06, %v1844_v38  ;;  %v1750_v7 = vsel %vm1749_vm6, %v1747_v50, %v1744_v18  ;;  %v1778_v56 = vadd.f32 1.0, %v3573_v60  ;;  %v1720_v48 = vmul.f32 %v3494_v36, %v1719_v29 }
 0x249   : > { %v2504_v10 = vpop.eup %2503  ;;  %v2222_v58 = vpack.c.bf16 %v1910_v25, %v1909_v30  ;;  %v1814_v2 = vadd.f32 %v1750_v7, %v1302_v16  ;;  %v1769_v0 = vadd.f32 1.0, %v3580_v19  ;;  %v1738_v40 = vmul.f32 %v3515_v27, %v1737_v43 }
 0x24a   : > { %2507 = vlog2.f32 %v1778_v56  ;;  %v1735_v63 = vmul.f32 0.6931472, %v2504_v10  ;;  %vm1722_vm8 = vcmp.lt.f32.partialorder %v1721_v13, 0.0004427343  ;;  %vm1740_vm9 = vcmp.lt.f32.partialorder %v1739_v47, 0.0004427343 }
 0x24b   : > { %2238 = vst [vmem:[%s3177_s14 + $0x28] sm:$0xff] %v2222_v58   ;;  %v1846_v6 = vsel %vm1334_vm7, %v3388_v15, %v1814_v2  ;;  %2509 = vrcp.f32 %v1876_v21  ;;  %v1765_v15 = vmul.f32 %v3544_v53, %v1764_v1  ;;  %v1723_v41 = vsel %vm1722_vm8, %v1720_v48, %v1717_v3 }
 0x24c   : > { %v2506_v62 = vpop.eup %2505  ;;  %v1878_v11 = vadd.f32 1e-06, %v1846_v6  ;;  %2511 = vlog2.f32 %v1751_v52  ;;  %v1741_v26 = vsel %vm1740_vm9, %v1738_v40, %v1735_v63  ;;  %vm1767_vm10 = vcmp.lt.f32.partialorder %v1766_v61, 0.0004427343 }
 0x24d   : > { %v1762_v24 = vmul.f32 0.6931472, %v2506_v62  ;;  %v1299_v31 = vmax.f32 %v3326_v44, 0.0  ;;  %v1301_v37 = vmax.f32 %v3383_v39, 0.0  ;;  %v1781_v5 = vmul.f32 -0.5, %v3573_v60 }
 0x24e   : > { %2513 = vrcp.f32 %v1878_v11  ;;  %v1304_v36 = vmax.f32 %v3439_v17, 0.0  ;;  %vm1331_vm11 = vcmp.ne.f32.partialorder %v3326_v44, %v3326_v44  ;;  %vm1333_vm12 = vcmp.ne.f32.partialorder %v3383_v39, %v3383_v39 }
 0x24f   : > { %2515 = vlog2.f32 %v1769_v0  ;;  %v1768_v23 = vsel %vm1767_vm10, %v1765_v15, %v1762_v24  ;;  %v1811_v4 = vadd.f32 %v1723_v41, %v1299_v31  ;;  %v1813_v27 = vadd.f32 %v1741_v26, %v1301_v37 }
 0x250   : > { %v1816_v32 = vadd.f32 %v1768_v23, %v1304_v36  ;;  %v1782_v34 = vadd.f32 1.0, %v1781_v5  ;;  %v1784_v53 = vand.u32 2147483647, %v3573_v60  ;;  %vm1336_vm13 = vcmp.ne.f32.partialorder %v3439_v17, %v3439_v17 }
 0x251   : > { %v1843_v55 = vsel %vm1331_vm11, %v3326_v44, %v1811_v4  ;;  %v1845_v22 = vsel %vm1333_vm12, %v3383_v39, %v1813_v27  ;;  %v1306_v54 = vmax.f32 %v3485_v57, 0.0  ;;  %v1754_v16 = vmul.f32 -0.5, %v3567_v8 }
 0x252   : > { %v1848_v20 = vsel %vm1336_vm13, %v3439_v17, %v1816_v32  ;;  %v1772_v33 = vmul.f32 -0.5, %v3580_v19  ;;  %v1783_v59 = vmul.f32 %v3573_v60, %v1782_v34  ;;  %v1875_v44 = vadd.f32 1e-06, %v1843_v55 }
 0x253   : > { %v1877_v42 = vadd.f32 1e-06, %v1845_v22  ;;  %vm1785_vm14 = vcmp.lt.f32.partialorder %v1784_v53, 0.0004427343  ;;  %v1880_v9 = vadd.f32 1e-06, %v1848_v20  ;;  %vm1338_vm15 = vcmp.ne.f32.partialorder %v3485_v57, %v3485_v57 }
 0x254   : > { %v1755_v25 = vadd.f32 1.0, %v1754_v16  ;;  %v1773_v38 = vadd.f32 1.0, %v1772_v33  ;;  %v1757_v60 = vand.u32 2147483647, %v3567_v8  ;;  %v1775_v21 = vand.u32 2147483647, %v3580_v19 }
 0x255   : > { %2517 = vrcp.f32 %v1880_v9  ;;  %v1303_v29 = vmax.f32 %v3451_v12, 0.0  ;;  %vm1335_vm2 = vcmp.ne.f32.partialorder %v3451_v12, %v3451_v12  ;;  %vm1337_vm3 = vcmp.ne.f32.partialorder %v3482_v46, %v3482_v46 }
 0x256   : > { %v1756_v13 = vmul.f32 %v3567_v8, %v1755_v25  ;;  %v1774_v2 = vmul.f32 %v3580_v19, %v1773_v38  ;;  %vm1758_vm0 = vcmp.lt.f32.partialorder %v1757_v60, 0.0004427343  ;;  %vm1776_vm1 = vcmp.lt.f32.partialorder %v1775_v21, 0.0004427343 }
 0x257   : > { %v2508_v45 = vpop.eup %2507 }
 0x258   : > { %v2510_v28 = vpop.eup %2509  ;;  %v1780_v30 = vmul.f32 0.6931472, %v2508_v45 }
 0x259   : > { %v2512_v51 = vpop.eup %2511  ;;  %v1911_v17 = vmul.f32 %v2510_v28, %v1875_v44 }
 0x25a   : > { %v1786_v14 = vsel %vm1785_vm14, %v1783_v59, %v1780_v30  ;;  %v1753_v56 = vmul.f32 0.6931472, %v2512_v51 }
 0x25b   : > { %v2514_v39 = vpop.eup %2513  ;;  %v1818_v50 = vadd.f32 %v1786_v14, %v1306_v54 }
 0x25c   : > { %v2516_v49 = vpop.eup %2515  ;;  %v1912_v18 = vmul.f32 %v2514_v39, %v1877_v42  ;;  %v1759_v52 = vsel %vm1758_vm0, %v1756_v13, %v1753_v56 }
 0x25d   : > { %v1850_v7 = vsel %vm1338_vm15, %v3485_v57, %v1818_v50  ;;  %v1771_v10 = vmul.f32 0.6931472, %v2516_v49  ;;  %v1305_v57 = vmax.f32 %v3482_v46, 0.0  ;;  %v1815_v43 = vadd.f32 %v1759_v52, %v1303_v29 }
 0x25e   : > { %v2227_v35 = vpack.c.bf16 %v1912_v18, %v1911_v17  ;;  %v1882_v58 = vadd.f32 1e-06, %v1850_v7 }
 0x25f   : > { %v1777_v3 = vsel %vm1776_vm1, %v1774_v2, %v1771_v10  ;;  %v1847_v8 = vsel %vm1335_vm2, %v3451_v12, %v1815_v43 }
 0x260   : > { %2239 = vst [vmem:[%s3177_s14 + $0x30] sm:$0xff] %v2227_v35   ;;  %2519 = vrcp.f32 %v1882_v58  ;;  %v1817_v47 = vadd.f32 %v1777_v3, %v1305_v57  ;;  %v1879_v1 = vadd.f32 1e-06, %v1847_v8 }
 0x262   : > { %v1849_v19 = vsel %vm1337_vm3, %v3482_v46, %v1817_v47  ;;  %v2518_v6 = vpop.eup %2517 }
 0x263   : > { %v1881_v0 = vadd.f32 1e-06, %v1849_v19  ;;  %v1913_v63 = vmul.f32 %v2518_v6, %v1879_v1 }
 0x26d   : > { %v2520_v62 = vpop.eup %2519 }
 0x26e   : > { %v1914_v11 = vmul.f32 %v2520_v62, %v1881_v0 }
 0x270   : > { %v2232_v12 = vpack.c.bf16 %v1914_v11, %v1913_v63 }
 0x272   : > { %2240 = vst [vmem:[%s3177_s14 + $0x38] sm:$0xff] %v2232_v12  }
 0x273   : > { %2534 = shalt.err (!%p2531_p3)
}
 0x274   : > { %s2535_s24 = scalar_lea.hbm %s3635_s29, 1024  ;;  %s2539_s15 = scalar_lea.hbm %s3693_s11, 2048 }
 0x275   : > { %p2536_p4 = scmp.ne.s32.totalorder %s3635_s29, %s2535_s24  ;;  %p2540_p9 = scmp.lt.s32.totalorder %s3635_s29, %s3693_s11 }
 0x276   : > { %p2541_p10 = scmp.lt.s32.totalorder %s2539_s15, %s2535_s24 }
 0x277   : > { %p2537_p7 = pnand %p2536_p4, %p2685_p5 }
 0x278   : > { %p2542_p11 = por %p2541_p10, %p2540_p9 }
 0x279   : > { %p2538_p8 = pneg %p2537_p7 }
 0x27b   : > { %p2543_p12 = pnand %p2542_p11, %p2538_p8 }
 0x27d   : > { %2546 = shalt.err (!%p2543_p12)
}
 0x27e   : > { %s2585_s21 = smov 64   ;;  %s2586_s13 = smov 4  }
 0x27f   : > { %2304 = dma.vmem_to_hbm [thread:$0]  (%p2685_p5), %s3637_s22, 1024, %s3635_s29, %s3642_s30, %s2585_s21, %s2585_s21, %s2586_s13  }
 0x280 PF: > { %p2310_p13 = scmp.ge.s32.totalorder %s2581_s20, 2  ;;  %s2024_s16 = sand.u32 1, %s2569_s17  }
 0x281   : > { %s2025_s0 = scalar_lea.sflag [#allocation3], %s2024_s16 }
 0x282   : > { %p2307_p0 = pnand %p2310_p13, %p2689_p6 }
 0x284   : > { %p2308_p1 = pneg %p2307_p0 }
 0x286   : > { %2564 = dma.done.wait (%p2308_p1), %s2025_s0, 1024  }
 0x287   : > { %2566 = vsyncadd (%p2308_p1), %s2025_s0, 4294966272  ;;  %p21_p2 = scmp.ge.s32.totalorder %s2672_s23, 4   ;;  %s3734_s17 = smov %s2573_s18 }
 0x288   : > { %s3735_s18 = smov %s2577_s19  ;;  %s3736_s19 = smov %s2683_s26 }
 0x289   : > { %s3737_s20 = smov %s2672_s23  ;;  %23 = sbr.rel (!%p21_p2) target bundleno = 5 (0x5), region = 108 }
 0x28e   :  { %2030 = vsyncpa [#allocation3], 1 }
 0x28f   :  { %2032 = vsyncpa [#allocation3 + $0x1], 1 }

</bundles_post_ra>
